<compile_context>
chip_gen: v5e
topology: v5e:2x2
jax: 0.10.0
libtpu: 0.0.40
codegen_flags: <defaults>
</compile_context>

<pallas_src>
from functools import partial

import jax
import jax.numpy as jnp
from jax import lax
from jax.experimental import pallas as pl
from jax.experimental.pallas import tpu as pltpu


def _round_up(x, m):
    return (x + m - 1) // m * m


# ----------------------------------------------------------------------------
# generation-aware VMEM budgeting
# ----------------------------------------------------------------------------
def _detect_vmem_capacity():
    default_cap = 64 * 1024 * 1024  # conservative (v7x physical VMEM)
    try:
        info = pltpu.get_tpu_info()
    except Exception:
        return default_cap
    for attr in ("vmem_capacity_bytes", "vmem_bytes", "vmem_size_bytes",
                 "vmem_capacity"):
        try:
            v = int(getattr(info, attr))
        except (AttributeError, TypeError, ValueError):
            continue
        if v > 0:
            return v
    return default_cap


_VMEM_CAP = _detect_vmem_capacity()
# Scoped VMEM limit we request (>= the default on every generation, <= phys).
_VMEM_LIMIT = int(min(_VMEM_CAP // 2, 64 * 1024 * 1024))
# Budget for the double-buffered operands of one conv kernel.
_TILE_BUDGET = int(min(_VMEM_CAP // 3, 24 * 1024 * 1024))


# ----------------------------------------------------------------------------
# tile-size helpers
# ----------------------------------------------------------------------------
def _pick_bm(M):
    """Row tile: returns (bm, Mp) with Mp >= M, Mp % 8 == 0, Mp % bm == 0."""
    Mp = _round_up(M, 8)
    for bm in (512, 256, 128, 64, 32, 16, 8):
        if Mp % bm == 0:
            return bm, Mp
    return 8, Mp


def _pick_bn(N):
    """Output-channel tile: whole N for small layers (maximal weight DMAs);
    N/2 for the wide stage-4/5 layers so a 'parallel' grid axis has 2 blocks
    for megacore, while each step still streams a multi-MB weight slab."""
    if N >= 1024 and N % 256 == 0:
        return N // 2
    return N


# ----------------------------------------------------------------------------
# Pallas kernels
# ----------------------------------------------------------------------------
def _accumulate(x_ref, w_ref, acc_ref):
    if len(x_ref.shape) == 3:
        # tapped path: (t_block, bm, Kc) @ (t_block, Kc, bn), unrolled dots
        for t in range(x_ref.shape[0]):
            acc_ref[...] += jnp.dot(x_ref[t], w_ref[t],
                                    preferred_element_type=jnp.float32)
    else:
        acc_ref[...] += jnp.dot(x_ref[...], w_ref[...],
                                preferred_element_type=jnp.float32)


def _mm_bn_kernel(x_ref, w_ref, b_ref, o_ref, acc_ref, *, relu, n_red):
    @pl.when(pl.program_id(2) == 0)
    def _():
        acc_ref[...] = jnp.zeros_like(acc_ref)

    _accumulate(x_ref, w_ref, acc_ref)

    @pl.when(pl.program_id(2) == n_red - 1)
    def _():
        y = acc_ref[...] + b_ref[...]
        if relu:
            y = jnp.maximum(y, 0.0)
        o_ref[...] = y.astype(o_ref.dtype)


def _mm_bn_res_kernel(x_ref, w_ref, b_ref, r_ref, o_ref, acc_ref, *,
                      relu, n_red):
    @pl.when(pl.program_id(2) == 0)
    def _():
        acc_ref[...] = jnp.zeros_like(acc_ref)

    _accumulate(x_ref, w_ref, acc_ref)

    @pl.when(pl.program_id(2) == n_red - 1)
    def _():
        y = acc_ref[...] + b_ref[...] + r_ref[...].astype(jnp.float32)
        if relu:
            y = jnp.maximum(y, 0.0)
        o_ref[...] = y.astype(o_ref.dtype)


def _max3_kernel(a_ref, b_ref, c_ref, o_ref):
    o_ref[...] = jnp.maximum(jnp.maximum(a_ref[...], b_ref[...]), c_ref[...])


# ----------------------------------------------------------------------------
# Fused conv building block:  act((sum_k x_k @ w_k) + bias [+ res])
# (BN scale is already folded into w; bias is the folded BN bias.)
# ----------------------------------------------------------------------------
def fused_matmul_bn_act(x, w, bias, *, residual=None, relu=True,
                        out_dtype=jnp.bfloat16):
    """x: (M, K)  with w (K, N)           -- plain path, K tiled on the grid
       x: (T, M, Kc) with w (T, Kc, N)    -- tap path, taps are the red. axis
       bias broadcastable to (1, N) f32; residual: (M, N)."""
    tapped = x.ndim == 3
    if tapped:
        T, M, Kc = x.shape
        N = w.shape[-1]
    else:
        M, K = x.shape
        N = w.shape[-1]

    bm, Mp = _pick_bm(M)
    bn = _pick_bn(N)
    has_res = residual is not None

    def est(kk):
        # double-buffered bf16 operands + f32 accumulator
        b = 2 * (bm * kk * 2)          # x tile
        b += 2 * (kk * bn * 2)         # w tile
        b += 2 * (bm * bn * 2)         # out tile
        b += bm * bn * 4               # accumulator
        if has_res:
            b += 2 * (bm * bn * 2)
        return b

    if tapped:
        t_block = 1
        for tb in (T, 3, 1):
            if T % tb == 0 and est(tb * Kc) <= _TILE_BUDGET:
                t_block = tb
                break
        nk = T // t_block
    else:
        tk = K
        while est(tk) > _TILE_BUDGET and tk % 256 == 0:
            tk //= 2
        nk = K // tk

    nj, ni = N // bn, Mp // bm

    x = x.astype(jnp.bfloat16)
    w = w.astype(jnp.bfloat16)
    bias = bias.reshape(1, N).astype(jnp.float32)

    if Mp != M:
        pad = ((0, 0), (0, Mp - M), (0, 0)) if tapped else ((0, Mp - M), (0, 0))
        x = jnp.pad(x, pad)

    if tapped:
        x_spec = pl.BlockSpec((t_block, bm, Kc), lambda j, i, k: (k, i, 0))
        w_spec = pl.BlockSpec((t_block, Kc, bn), lambda j, i, k: (k, 0, j))
    else:
        x_spec = pl.BlockSpec((bm, tk), lambda j, i, k: (i, k))
        w_spec = pl.BlockSpec((tk, bn), lambda j, i, k: (k, j))

    in_specs = [x_spec, w_spec,
                pl.BlockSpec((1, bn), lambda j, i, k: (0, j))]
    args = [x, w, bias]

    if has_res:
        r = residual.astype(jnp.bfloat16)
        if Mp != M:
            r = jnp.pad(r, ((0, Mp - M), (0, 0)))
        in_specs.append(pl.BlockSpec((bm, bn), lambda j, i, k: (i, j)))
        args.append(r)
        kernel = partial(_mm_bn_res_kernel, relu=relu, n_red=nk)
    else:
        kernel = partial(_mm_bn_kernel, relu=relu, n_red=nk)

    out = pl.pallas_call(
        kernel,
        out_shape=jax.ShapeDtypeStruct((Mp, N), out_dtype),
        grid=(nj, ni, nk),
        in_specs=in_specs,
        out_specs=pl.BlockSpec((bm, bn), lambda j, i, k: (i, j)),
        scratch_shapes=[pltpu.VMEM((bm, bn), jnp.float32)],
        compiler_params=pltpu.CompilerParams(
            dimension_semantics=("parallel", "parallel", "arbitrary"),
            vmem_limit_bytes=_VMEM_LIMIT),
    )(*args)
    return out[:M] if Mp != M else out


def conv2d_bn_act(x_nhwc, w_hwio, bias, *, stride=1, padding=0,
                  dilation=1, relu=True, residual=None):
    """Conv2d + folded BN (+ residual) (+ ReLU).  x: NHWC, w: (KH,KW,Cin,Cout)
    with the BN scale already folded into w."""
    Nb, H, W, Cin = x_nhwc.shape
    KH, KW, _, Cout = w_hwio.shape
    s, p, d = stride, padding, dilation
    Ho = (H + 2 * p - d * (KH - 1) - 1) // s + 1
    Wo = (W + 2 * p - d * (KW - 1) - 1) // s + 1
    M = Nb * Ho * Wo

    xp = jnp.pad(x_nhwc, ((0, 0), (p, p), (p, p), (0, 0))) if p > 0 else x_nhwc
    res2d = None if residual is None else residual.reshape(M, Cout)

    if KH == 1 and KW == 1:
        xs = xp if s == 1 else xp[:, ::s, ::s, :]
        xs = xs[:, :Ho, :Wo, :]
        y2d = fused_matmul_bn_act(xs.reshape(M, Cin),
                                  w_hwio.reshape(Cin, Cout),
                                  bias, residual=res2d, relu=relu)
    else:
        views = []
        for kh in range(KH):
            for kw in range(KW):
                v = lax.slice(
                    xp,
                    (0, kh * d, kw * d, 0),
                    (Nb, kh * d + (Ho - 1) * s + 1,
                     kw * d + (Wo - 1) * s + 1, Cin),
                    (1, s, s, 1))
                views.append(v.reshape(M, Cin))
        if Cin >= 64:
            # Per-tap-contiguous stack; the tap axis is blocked on the grid
            # (usually all 9 taps in one step with an unrolled dot loop).
            x_taps = jnp.stack(views, axis=0)               # (T, M, Cin)
            w_taps = w_hwio.reshape(KH * KW, Cin, Cout)     # (T, Cin, Cout)
            y2d = fused_matmul_bn_act(x_taps, w_taps, bias,
                                      residual=res2d, relu=relu)
        else:
            # Tiny Cin (stem, Cin=3): im2col keeps the MXU contraction wide.
            patches = jnp.stack(views, axis=1).reshape(M, KH * KW * Cin)
            w2d = w_hwio.reshape(KH * KW * Cin, Cout)
            y2d = fused_matmul_bn_act(patches, w2d, bias,
                                      residual=res2d, relu=relu)
    return y2d.reshape(Nb, Ho, Wo, Cout)


# ----------------------------------------------------------------------------
# MaxPool 3x3 / stride 2 / pad 1 (separable: 1-D max over W, then over H)
# ----------------------------------------------------------------------------
def _max3(views):
    M, C = views[0].shape
    dtype = views[0].dtype
    if (M * C) % 128 == 0:      # lane-dense layout -> full-width stores
        R, L = (M * C) // 128, 128
    else:
        R, L = M, C
    views = [v.reshape(R, L) for v in views]

    br, Rp = _pick_bm(R)
    if Rp != R:
        views = [jnp.pad(v, ((0, Rp - R), (0, 0)),
                         constant_values=float("-inf")) for v in views]

    out = pl.pallas_call(
        _max3_kernel,
        out_shape=jax.ShapeDtypeStruct((Rp, L), dtype),
        grid=(Rp // br,),
        in_specs=[pl.BlockSpec((br, L), lambda i: (i, 0)) for _ in range(3)],
        out_specs=pl.BlockSpec((br, L), lambda i: (i, 0)),
        compiler_params=pltpu.CompilerParams(
            dimension_semantics=("parallel",)),
    )(*views)
    if Rp != R:
        out = out[:R]
    return out.reshape(M, C)


def maxpool2d(x_nhwc, *, kernel=3, stride=2, padding=1):
    assert kernel == 3
    Nb, H, W, C = x_nhwc.shape
    Ho = (H + 2 * padding - kernel) // stride + 1
    Wo = (W + 2 * padding - kernel) // stride + 1
    neg = float("-inf")

    # pass 1: 3-wide max along W (strided)
    xp = jnp.pad(x_nhwc, ((0, 0), (0, 0), (padding, padding), (0, 0)),
                 constant_values=neg)
    vw = [lax.slice(xp, (0, 0, k, 0),
                    (Nb, H, k + (Wo - 1) * stride + 1, C),
                    (1, 1, stride, 1)).reshape(-1, C)
          for k in range(kernel)]
    t = _max3(vw).reshape(Nb, H, Wo, C)

    # pass 2: 3-wide max along H (strided)
    tp = jnp.pad(t, ((0, 0), (padding, padding), (0, 0), (0, 0)),
                 constant_values=neg)
    vh = [lax.slice(tp, (0, k, 0, 0),
                    (Nb, k + (Ho - 1) * stride + 1, Wo, C),
                    (1, stride, 1, 1)).reshape(-1, C)
          for k in range(kernel)]
    return _max3(vh).reshape(Nb, Ho, Wo, C)


# ----------------------------------------------------------------------------
# Deterministic parameter construction (resnet50 topology, synthetic weights)
# ----------------------------------------------------------------------------
def make_conv_bn(key, kh, kw, cin, cout, *, stride=1, padding=0, dilation=1):
    kconv, k1, k2, k3, k4 = jax.random.split(key, 5)
    fan_in = kh * kw * cin
    w = jax.random.normal(kconv, (kh, kw, cin, cout), jnp.float32) * jnp.sqrt(
        2.0 / fan_in)
    gamma = jax.random.uniform(k1, (cout,), jnp.float32, 0.8, 1.2)
    beta = 0.1 * jax.random.normal(k2, (cout,), jnp.float32)
    mean = 0.1 * jax.random.normal(k3, (cout,), jnp.float32)
    var = jax.random.uniform(k4, (cout,), jnp.float32, 0.5, 1.5)
    scale = gamma / jnp.sqrt(var + 1e-5)
    bias = beta - mean * scale
    # Fold the BN scale into the conv weights in f32, then cast to bf16.
    w_folded = (w * scale.reshape(1, 1, 1, cout)).astype(jnp.bfloat16)
    return {
        "w": w_folded,
        "bias": bias.reshape(1, cout),
        "stride": stride,
        "padding": padding,
        "dilation": dilation,
        "ksize": kh,
    }


def build_params(seed=0):
    root = jax.random.PRNGKey(seed)
    counter = [0]

    def nk():
        counter[0] += 1
        return jax.random.fold_in(root, counter[0])

    params = {"stem": make_conv_bn(nk(), 7, 7, 3, 64, stride=2, padding=3)}
    cfg = [
        ("block2", 3, 64, 256, 1),
        ("block3", 4, 128, 512, 2),
        ("block4", 6, 256, 1024, 2),
        ("block5", 3, 512, 2048, 2),
    ]
    cin = 64
    for name, nblocks, mid, cout, stride in cfg:
        blocks = []
        for i in range(nblocks):
            s = stride if i == 0 else 1
            blk_cin = cin if i == 0 else cout
            blk = {
                "conv1": make_conv_bn(nk(), 1, 1, blk_cin, mid),
                "conv2": make_conv_bn(nk(), 3, 3, mid, mid, stride=s, padding=1),
                "conv3": make_conv_bn(nk(), 1, 1, mid, cout),
            }
            if i == 0 and (s != 1 or blk_cin != cout):
                blk["downsample"] = make_conv_bn(nk(), 1, 1, blk_cin, cout,
                                                 stride=s)
            blocks.append(blk)
        params[name] = blocks
        cin = cout
    return params


def resnet_block_dilation_params(blocks, dilation_0=None, dilation=2):
    """Mirror of the PyTorch `resnet_block_dilation` on our param dicts."""
    for i, blk in enumerate(blocks):
        if i == 0:
            if "downsample" in blk:
                blk["downsample"]["stride"] = 1
            for name in ("conv1", "conv2", "conv3"):
                c = blk[name]
                if c["stride"] == 2:
                    c["stride"] = 1
                    if dilation_0 and c["ksize"] == 3:
                        c["dilation"] = dilation_0
                        c["padding"] = dilation_0
        else:
            for name in ("conv1", "conv2", "conv3"):
                c = blk[name]
                if c["ksize"] == 3:
                    c["dilation"] = dilation
                    c["padding"] = dilation
    return blocks


# ----------------------------------------------------------------------------
# Forward pass (== ResNet_STAGE45.forward)
# ----------------------------------------------------------------------------
def _apply_conv(x, c, *, relu, residual=None):
    return conv2d_bn_act(
        x, c["w"], c["bias"],
        stride=c["stride"], padding=c["padding"], dilation=c["dilation"],
        relu=relu, residual=residual)


def _bottleneck(x, blk):
    identity = x
    out = _apply_conv(x, blk["conv1"], relu=True)
    out = _apply_conv(out, blk["conv2"], relu=True)
    if "downsample" in blk:
        identity = _apply_conv(x, blk["downsample"], relu=False)
    # conv3 + bn3 + residual add + relu, fused in one kernel.
    return _apply_conv(out, blk["conv3"], relu=True, residual=identity)


def resnet_stage45_forward(x_nchw, params):
    x = jnp.transpose(x_nchw, (0, 2, 3, 1)).astype(jnp.bfloat16)  # NCHW->NHWC
    # block1: conv7x7/2 + bn + relu + maxpool3x3/2
    x = _apply_conv(x, params["stem"], relu=True)
    x = maxpool2d(x)
    for blk in params["block2"]:
        x = _bottleneck(x, blk)
    for blk in params["block3"]:
        x = _bottleneck(x, blk)
    for blk in params["block4"]:
        x = _bottleneck(x, blk)
    x4 = x
    for blk in params["block5"]:
        x = _bottleneck(x, blk)
    x5 = x
    x4 = jnp.transpose(x4, (0, 3, 1, 2)).astype(jnp.float32)
    x5 = jnp.transpose(x5, (0, 3, 1, 2)).astype(jnp.float32)
    return (x4, x5)


# ----------------------------------------------------------------------------
# Pure-JAX single-layer reference (for correctness checks)
# ----------------------------------------------------------------------------
def _conv_ref(x, w, bias, *, stride, padding, dilation, relu, residual=None):
    y = lax.conv_general_dilated(
        x, w, window_strides=(stride, stride),
        padding=[(padding, padding), (padding, padding)],
        rhs_dilation=(dilation, dilation),
        dimension_numbers=("NHWC", "HWIO", "NHWC"))
    y = y + bias.reshape(1, 1, 1, -1)
    if residual is not None:
        y = y + residual
    if relu:
        y = jnp.maximum(y, 0.0)
    return y


# ----------------------------------------------------------------------------
if __name__ == "__main__":
    # --- single-layer correctness checks (kernel vs lax conv, f32 ref) ------
    key = jax.random.PRNGKey(0)
    kx, kw, kb, kr = jax.random.split(key, 4)
    cx = jax.random.normal(kx, (2, 16, 16, 64), jnp.float32).astype(jnp.bfloat16)
    cw = (jax.random.normal(kw, (3, 3, 64, 128), jnp.float32)
          * jnp.sqrt(2.0 / (9 * 64))).astype(jnp.bfloat16)
    cb = 0.1 * jax.random.normal(kb, (1, 128), jnp.float32)
    cres = jax.random.normal(kr, (2, 8, 8, 128), jnp.float32).astype(jnp.bfloat16)

    def _check(y_kern, y_ref):
        err = float(jnp.max(jnp.abs(y_kern.astype(jnp.float32) - y_ref)))
        tol = 0.02 * float(jnp.max(jnp.abs(y_ref))) + 0.02
        assert err <= tol, (err, tol)

    # strided 3x3 tap path + residual + relu epilogue
    y_k = jax.jit(lambda a, b: conv2d_bn_act(
        a, cw, cb, stride=2, padding=1, dilation=1, relu=True,
        residual=b))(cx, cres)
    y_r = _conv_ref(cx.astype(jnp.float32), cw.astype(jnp.float32), cb,
                    stride=2, padding=1, dilation=1, relu=True,
                    residual=cres.astype(jnp.float32))
    _check(y_k, y_r)

    # dilated 3x3 tap path (block5 style)
    y_k = jax.jit(lambda a: conv2d_bn_act(
        a, cw, cb, stride=1, padding=2, dilation=2, relu=True))(cx)
    y_r = _conv_ref(cx.astype(jnp.float32), cw.astype(jnp.float32), cb,
                    stride=1, padding=2, dilation=2, relu=True)
    _check(y_k, y_r)

    # --- full forward --------------------------------------------------------
    # TODO(synk): pretrained torchvision weights are not loaded; parameters are
    # deterministic synthetic (He-init conv + folded random BN stats).
    params = build_params(seed=0)
    # ResNet_STAGE45(name="resnet50", train_backbone=False, dilation_block5=True)
    params["block5"] = resnet_block_dilation_params(params["block5"], dilation=2)

    x = jax.random.normal(jax.random.PRNGKey(0), (2, 3, 64, 64), jnp.float32)

    forward = jax.jit(lambda inp: resnet_stage45_forward(inp, params))
    x4, x5 = forward(x)
    jax.block_until_ready((x4, x5))

    assert x4.shape == (2, 1024, 4, 4), x4.shape
    assert x5.shape == (2, 2048, 4, 4), x5.shape  # dilated block5 keeps stride
    assert bool(jnp.all(jnp.isfinite(x4))) and bool(jnp.all(jnp.isfinite(x5)))
    print("KERNEL_OK")
</pallas_src>

<mosaic_0001>
module attributes {stable_mosaic.version = 11 : i64} {
  func.func @_mm_bn_res_kernel(%arg0: i32, %arg1: i32, %arg2: i32, %arg3: memref<9x128x64xbf16, #tpu.memory_space<vmem>>, %arg4: memref<9x64x128xbf16, #tpu.memory_space<vmem>>, %arg5: memref<1x128xf32, #tpu.memory_space<vmem>>, %arg6: memref<128x128xbf16, #tpu.memory_space<vmem>>, %arg7: memref<128x128xbf16, #tpu.memory_space<vmem>>, %arg8: memref<128x128xf32, #tpu.memory_space<vmem>>) attributes {dimension_semantics = [#tpu.dimension_semantics<parallel>, #tpu.dimension_semantics<parallel>, #tpu.dimension_semantics<arbitrary>], iteration_bounds = array<i64: 1, 1, 1>, scalar_prefetch = 0 : i64, scratch_operands = 1 : i64, tpu.core_type = #tpu.core_type<tc>, window_params = [{transform_indices = @transform_0, window_bounds = array<i64: 9, 128, 64>}, {transform_indices = @transform_1, window_bounds = array<i64: 9, 64, 128>}, {transform_indices = @transform_2, window_bounds = array<i64: 1, 128>}, {transform_indices = @transform_3, window_bounds = array<i64: 128, 128>}, {transform_indices = @transform_4, window_bounds = array<i64: 128, 128>}]} {
    %c0_i32 = arith.constant 0 : i32
    %0 = arith.cmpi eq, %arg2, %c0_i32 : i32
    %1 = arith.extui %0 : i1 to i32
    %c0_i32_0 = arith.constant 0 : i32
    %2 = arith.cmpi ne, %1, %c0_i32_0 : i32
    scf.if %2 {
      %cst_92 = arith.constant 0.000000e+00 : f32
      %78 = vector.broadcast %cst_92 : f32 to vector<128x128xf32>
      %c0_93 = arith.constant 0 : index
      %c0_94 = arith.constant 0 : index
      %79 = vector.load %arg8[%c0_93, %c0_94] : memref<128x128xf32, #tpu.memory_space<vmem>>, vector<128x128xf32>
      tpu.vector_store %arg8[%c0_93, %c0_94], %78 {strides = array<i32>} : memref<128x128xf32, #tpu.memory_space<vmem>>, vector<128x128xf32>,
    } else {
    }
    %c0 = arith.constant 0 : index
    %c0_1 = arith.constant 0 : index
    %3 = vector.load %arg8[%c0, %c0_1] : memref<128x128xf32, #tpu.memory_space<vmem>>, vector<128x128xf32>
    %c0_2 = arith.constant 0 : index
    %c0_3 = arith.constant 0 : index
    %c0_4 = arith.constant 0 : index
    %4 = vector.load %arg3[%c0_2, %c0_3, %c0_4] : memref<9x128x64xbf16, #tpu.memory_space<vmem>>, vector<1x128x64xbf16>
    %5 = vector.shape_cast %4 : vector<1x128x64xbf16> to vector<128x64xbf16>
    %c0_5 = arith.constant 0 : index
    %c0_6 = arith.constant 0 : index
    %c0_7 = arith.constant 0 : index
    %6 = vector.load %arg4[%c0_5, %c0_6, %c0_7] : memref<9x64x128xbf16, #tpu.memory_space<vmem>>, vector<1x64x128xbf16>
    %7 = vector.shape_cast %6 : vector<1x64x128xbf16> to vector<64x128xbf16>
    %cst = arith.constant dense<0.000000e+00> : vector<128x128xf32>
    %8 = tpu.matmul %5, %7, %cst {dimension_numbers = #tpu.dot_dimension_numbers<[1], [0], [0], [1], [0, 0, 1, 1], [], []>} : vector<128x64xbf16>, vector<64x128xbf16>, vector<128x128xf32> -> vector<128x128xf32>
    %9 = arith.addf %3, %8 : vector<128x128xf32>
    %c0_8 = arith.constant 0 : index
    %c0_9 = arith.constant 0 : index
    %10 = vector.load %arg8[%c0_8, %c0_9] : memref<128x128xf32, #tpu.memory_space<vmem>>, vector<128x128xf32>
    tpu.vector_store %arg8[%c0_8, %c0_9], %9 {strides = array<i32>} : memref<128x128xf32, #tpu.memory_space<vmem>>, vector<128x128xf32>,
    %c0_10 = arith.constant 0 : index
    %c0_11 = arith.constant 0 : index
    %11 = vector.load %arg8[%c0_10, %c0_11] : memref<128x128xf32, #tpu.memory_space<vmem>>, vector<128x128xf32>
    %c1 = arith.constant 1 : index
    %c0_12 = arith.constant 0 : index
    %c0_13 = arith.constant 0 : index
    %12 = vector.load %arg3[%c1, %c0_12, %c0_13] : memref<9x128x64xbf16, #tpu.memory_space<vmem>>, vector<1x128x64xbf16>
    %13 = vector.shape_cast %12 : vector<1x128x64xbf16> to vector<128x64xbf16>
    %c1_14 = arith.constant 1 : index
    %c0_15 = arith.constant 0 : index
    %c0_16 = arith.constant 0 : index
    %14 = vector.load %arg4[%c1_14, %c0_15, %c0_16] : memref<9x64x128xbf16, #tpu.memory_space<vmem>>, vector<1x64x128xbf16>
    %15 = vector.shape_cast %14 : vector<1x64x128xbf16> to vector<64x128xbf16>
    %cst_17 = arith.constant dense<0.000000e+00> : vector<128x128xf32>
    %16 = tpu.matmul %13, %15, %cst_17 {dimension_numbers = #tpu.dot_dimension_numbers<[1], [0], [0], [1], [0, 0, 1, 1], [], []>} : vector<128x64xbf16>, vector<64x128xbf16>, vector<128x128xf32> -> vector<128x128xf32>
    %17 = arith.addf %11, %16 : vector<128x128xf32>
    %c0_18 = arith.constant 0 : index
    %c0_19 = arith.constant 0 : index
    %18 = vector.load %arg8[%c0_18, %c0_19] : memref<128x128xf32, #tpu.memory_space<vmem>>, vector<128x128xf32>
    tpu.vector_store %arg8[%c0_18, %c0_19], %17 {strides = array<i32>} : memref<128x128xf32, #tpu.memory_space<vmem>>, vector<128x128xf32>,
    %c0_20 = arith.constant 0 : index
    %c0_21 = arith.constant 0 : index
    %19 = vector.load %arg8[%c0_20, %c0_21] : memref<128x128xf32, #tpu.memory_space<vmem>>, vector<128x128xf32>
    %c2 = arith.constant 2 : index
    %c0_22 = arith.constant 0 : index
    %c0_23 = arith.constant 0 : index
    %20 = vector.load %arg3[%c2, %c0_22, %c0_23] : memref<9x128x64xbf16, #tpu.memory_space<vmem>>, vector<1x128x64xbf16>
    %21 = vector.shape_cast %20 : vector<1x128x64xbf16> to vector<128x64xbf16>
    %c2_24 = arith.constant 2 : index
    %c0_25 = arith.constant 0 : index
    %c0_26 = arith.constant 0 : index
    %22 = vector.load %arg4[%c2_24, %c0_25, %c0_26] : memref<9x64x128xbf16, #tpu.memory_space<vmem>>, vector<1x64x128xbf16>
    %23 = vector.shape_cast %22 : vector<1x64x128xbf16> to vector<64x128xbf16>
    %cst_27 = arith.constant dense<0.000000e+00> : vector<128x128xf32>
    %24 = tpu.matmul %21, %23, %cst_27 {dimension_numbers = #tpu.dot_dimension_numbers<[1], [0], [0], [1], [0, 0, 1, 1], [], []>} : vector<128x64xbf16>, vector<64x128xbf16>, vector<128x128xf32> -> vector<128x128xf32>
    %25 = arith.addf %19, %24 : vector<128x128xf32>
    %c0_28 = arith.constant 0 : index
    %c0_29 = arith.constant 0 : index
    %26 = vector.load %arg8[%c0_28, %c0_29] : memref<128x128xf32, #tpu.memory_space<vmem>>, vector<128x128xf32>
    tpu.vector_store %arg8[%c0_28, %c0_29], %25 {strides = array<i32>} : memref<128x128xf32, #tpu.memory_space<vmem>>, vector<128x128xf32>,
    %c0_30 = arith.constant 0 : index
    %c0_31 = arith.constant 0 : index
    %27 = vector.load %arg8[%c0_30, %c0_31] : memref<128x128xf32, #tpu.memory_space<vmem>>, vector<128x128xf32>
    %c3 = arith.constant 3 : index
    %c0_32 = arith.constant 0 : index
    %c0_33 = arith.constant 0 : index
    %28 = vector.load %arg3[%c3, %c0_32, %c0_33] : memref<9x128x64xbf16, #tpu.memory_space<vmem>>, vector<1x128x64xbf16>
    %29 = vector.shape_cast %28 : vector<1x128x64xbf16> to vector<128x64xbf16>
    %c3_34 = arith.constant 3 : index
    %c0_35 = arith.constant 0 : index
    %c0_36 = arith.constant 0 : index
    %30 = vector.load %arg4[%c3_34, %c0_35, %c0_36] : memref<9x64x128xbf16, #tpu.memory_space<vmem>>, vector<1x64x128xbf16>
    %31 = vector.shape_cast %30 : vector<1x64x128xbf16> to vector<64x128xbf16>
    %cst_37 = arith.constant dense<0.000000e+00> : vector<128x128xf32>
    %32 = tpu.matmul %29, %31, %cst_37 {dimension_numbers = #tpu.dot_dimension_numbers<[1], [0], [0], [1], [0, 0, 1, 1], [], []>} : vector<128x64xbf16>, vector<64x128xbf16>, vector<128x128xf32> -> vector<128x128xf32>
    %33 = arith.addf %27, %32 : vector<128x128xf32>
    %c0_38 = arith.constant 0 : index
    %c0_39 = arith.constant 0 : index
    %34 = vector.load %arg8[%c0_38, %c0_39] : memref<128x128xf32, #tpu.memory_space<vmem>>, vector<128x128xf32>
    tpu.vector_store %arg8[%c0_38, %c0_39], %33 {strides = array<i32>} : memref<128x128xf32, #tpu.memory_space<vmem>>, vector<128x128xf32>,
    %c0_40 = arith.constant 0 : index
    %c0_41 = arith.constant 0 : index
    %35 = vector.load %arg8[%c0_40, %c0_41] : memref<128x128xf32, #tpu.memory_space<vmem>>, vector<128x128xf32>
    %c4 = arith.constant 4 : index
    %c0_42 = arith.constant 0 : index
    %c0_43 = arith.constant 0 : index
    %36 = vector.load %arg3[%c4, %c0_42, %c0_43] : memref<9x128x64xbf16, #tpu.memory_space<vmem>>, vector<1x128x64xbf16>
    %37 = vector.shape_cast %36 : vector<1x128x64xbf16> to vector<128x64xbf16>
    %c4_44 = arith.constant 4 : index
    %c0_45 = arith.constant 0 : index
    %c0_46 = arith.constant 0 : index
    %38 = vector.load %arg4[%c4_44, %c0_45, %c0_46] : memref<9x64x128xbf16, #tpu.memory_space<vmem>>, vector<1x64x128xbf16>
    %39 = vector.shape_cast %38 : vector<1x64x128xbf16> to vector<64x128xbf16>
    %cst_47 = arith.constant dense<0.000000e+00> : vector<128x128xf32>
    %40 = tpu.matmul %37, %39, %cst_47 {dimension_numbers = #tpu.dot_dimension_numbers<[1], [0], [0], [1], [0, 0, 1, 1], [], []>} : vector<128x64xbf16>, vector<64x128xbf16>, vector<128x128xf32> -> vector<128x128xf32>
    %41 = arith.addf %35, %40 : vector<128x128xf32>
    %c0_48 = arith.constant 0 : index
    %c0_49 = arith.constant 0 : index
    %42 = vector.load %arg8[%c0_48, %c0_49] : memref<128x128xf32, #tpu.memory_space<vmem>>, vector<128x128xf32>
    tpu.vector_store %arg8[%c0_48, %c0_49], %41 {strides = array<i32>} : memref<128x128xf32, #tpu.memory_space<vmem>>, vector<128x128xf32>,
    %c0_50 = arith.constant 0 : index
    %c0_51 = arith.constant 0 : index
    %43 = vector.load %arg8[%c0_50, %c0_51] : memref<128x128xf32, #tpu.memory_space<vmem>>, vector<128x128xf32>
    %c5 = arith.constant 5 : index
    %c0_52 = arith.constant 0 : index
    %c0_53 = arith.constant 0 : index
    %44 = vector.load %arg3[%c5, %c0_52, %c0_53] : memref<9x128x64xbf16, #tpu.memory_space<vmem>>, vector<1x128x64xbf16>
    %45 = vector.shape_cast %44 : vector<1x128x64xbf16> to vector<128x64xbf16>
    %c5_54 = arith.constant 5 : index
    %c0_55 = arith.constant 0 : index
    %c0_56 = arith.constant 0 : index
    %46 = vector.load %arg4[%c5_54, %c0_55, %c0_56] : memref<9x64x128xbf16, #tpu.memory_space<vmem>>, vector<1x64x128xbf16>
    %47 = vector.shape_cast %46 : vector<1x64x128xbf16> to vector<64x128xbf16>
    %cst_57 = arith.constant dense<0.000000e+00> : vector<128x128xf32>
    %48 = tpu.matmul %45, %47, %cst_57 {dimension_numbers = #tpu.dot_dimension_numbers<[1], [0], [0], [1], [0, 0, 1, 1], [], []>} : vector<128x64xbf16>, vector<64x128xbf16>, vector<128x128xf32> -> vector<128x128xf32>
    %49 = arith.addf %43, %48 : vector<128x128xf32>
    %c0_58 = arith.constant 0 : index
    %c0_59 = arith.constant 0 : index
    %50 = vector.load %arg8[%c0_58, %c0_59] : memref<128x128xf32, #tpu.memory_space<vmem>>, vector<128x128xf32>
    tpu.vector_store %arg8[%c0_58, %c0_59], %49 {strides = array<i32>} : memref<128x128xf32, #tpu.memory_space<vmem>>, vector<128x128xf32>,
    %c0_60 = arith.constant 0 : index
    %c0_61 = arith.constant 0 : index
    %51 = vector.load %arg8[%c0_60, %c0_61] : memref<128x128xf32, #tpu.memory_space<vmem>>, vector<128x128xf32>
    %c6 = arith.constant 6 : index
    %c0_62 = arith.constant 0 : index
    %c0_63 = arith.constant 0 : index
    %52 = vector.load %arg3[%c6, %c0_62, %c0_63] : memref<9x128x64xbf16, #tpu.memory_space<vmem>>, vector<1x128x64xbf16>
    %53 = vector.shape_cast %52 : vector<1x128x64xbf16> to vector<128x64xbf16>
    %c6_64 = arith.constant 6 : index
    %c0_65 = arith.constant 0 : index
    %c0_66 = arith.constant 0 : index
    %54 = vector.load %arg4[%c6_64, %c0_65, %c0_66] : memref<9x64x128xbf16, #tpu.memory_space<vmem>>, vector<1x64x128xbf16>
    %55 = vector.shape_cast %54 : vector<1x64x128xbf16> to vector<64x128xbf16>
    %cst_67 = arith.constant dense<0.000000e+00> : vector<128x128xf32>
    %56 = tpu.matmul %53, %55, %cst_67 {dimension_numbers = #tpu.dot_dimension_numbers<[1], [0], [0], [1], [0, 0, 1, 1], [], []>} : vector<128x64xbf16>, vector<64x128xbf16>, vector<128x128xf32> -> vector<128x128xf32>
    %57 = arith.addf %51, %56 : vector<128x128xf32>
    %c0_68 = arith.constant 0 : index
    %c0_69 = arith.constant 0 : index
    %58 = vector.load %arg8[%c0_68, %c0_69] : memref<128x128xf32, #tpu.memory_space<vmem>>, vector<128x128xf32>
    tpu.vector_store %arg8[%c0_68, %c0_69], %57 {strides = array<i32>} : memref<128x128xf32, #tpu.memory_space<vmem>>, vector<128x128xf32>,
    %c0_70 = arith.constant 0 : index
    %c0_71 = arith.constant 0 : index
    %59 = vector.load %arg8[%c0_70, %c0_71] : memref<128x128xf32, #tpu.memory_space<vmem>>, vector<128x128xf32>
    %c7 = arith.constant 7 : index
    %c0_72 = arith.constant 0 : index
    %c0_73 = arith.constant 0 : index
    %60 = vector.load %arg3[%c7, %c0_72, %c0_73] : memref<9x128x64xbf16, #tpu.memory_space<vmem>>, vector<1x128x64xbf16>
    %61 = vector.shape_cast %60 : vector<1x128x64xbf16> to vector<128x64xbf16>
    %c7_74 = arith.constant 7 : index
    %c0_75 = arith.constant 0 : index
    %c0_76 = arith.constant 0 : index
    %62 = vector.load %arg4[%c7_74, %c0_75, %c0_76] : memref<9x64x128xbf16, #tpu.memory_space<vmem>>, vector<1x64x128xbf16>
    %63 = vector.shape_cast %62 : vector<1x64x128xbf16> to vector<64x128xbf16>
    %cst_77 = arith.constant dense<0.000000e+00> : vector<128x128xf32>
    %64 = tpu.matmul %61, %63, %cst_77 {dimension_numbers = #tpu.dot_dimension_numbers<[1], [0], [0], [1], [0, 0, 1, 1], [], []>} : vector<128x64xbf16>, vector<64x128xbf16>, vector<128x128xf32> -> vector<128x128xf32>
    %65 = arith.addf %59, %64 : vector<128x128xf32>
    %c0_78 = arith.constant 0 : index
    %c0_79 = arith.constant 0 : index
    %66 = vector.load %arg8[%c0_78, %c0_79] : memref<128x128xf32, #tpu.memory_space<vmem>>, vector<128x128xf32>
    tpu.vector_store %arg8[%c0_78, %c0_79], %65 {strides = array<i32>} : memref<128x128xf32, #tpu.memory_space<vmem>>, vector<128x128xf32>,
    %c0_80 = arith.constant 0 : index
    %c0_81 = arith.constant 0 : index
    %67 = vector.load %arg8[%c0_80, %c0_81] : memref<128x128xf32, #tpu.memory_space<vmem>>, vector<128x128xf32>
    %c8 = arith.constant 8 : index
    %c0_82 = arith.constant 0 : index
    %c0_83 = arith.constant 0 : index
    %68 = vector.load %arg3[%c8, %c0_82, %c0_83] : memref<9x128x64xbf16, #tpu.memory_space<vmem>>, vector<1x128x64xbf16>
    %69 = vector.shape_cast %68 : vector<1x128x64xbf16> to vector<128x64xbf16>
    %c8_84 = arith.constant 8 : index
    %c0_85 = arith.constant 0 : index
    %c0_86 = arith.constant 0 : index
    %70 = vector.load %arg4[%c8_84, %c0_85, %c0_86] : memref<9x64x128xbf16, #tpu.memory_space<vmem>>, vector<1x64x128xbf16>
    %71 = vector.shape_cast %70 : vector<1x64x128xbf16> to vector<64x128xbf16>
    %cst_87 = arith.constant dense<0.000000e+00> : vector<128x128xf32>
    %72 = tpu.matmul %69, %71, %cst_87 {dimension_numbers = #tpu.dot_dimension_numbers<[1], [0], [0], [1], [0, 0, 1, 1], [], []>} : vector<128x64xbf16>, vector<64x128xbf16>, vector<128x128xf32> -> vector<128x128xf32>
    %73 = arith.addf %67, %72 : vector<128x128xf32>
    %c0_88 = arith.constant 0 : index
    %c0_89 = arith.constant 0 : index
    %74 = vector.load %arg8[%c0_88, %c0_89] : memref<128x128xf32, #tpu.memory_space<vmem>>, vector<128x128xf32>
    tpu.vector_store %arg8[%c0_88, %c0_89], %73 {strides = array<i32>} : memref<128x128xf32, #tpu.memory_space<vmem>>, vector<128x128xf32>,
    %c0_i32_90 = arith.constant 0 : i32
    %75 = arith.cmpi eq, %arg2, %c0_i32_90 : i32
    %76 = arith.extui %75 : i1 to i32
    %c0_i32_91 = arith.constant 0 : i32
    %77 = arith.cmpi ne, %76, %c0_i32_91 : i32
    scf.if %77 {
      %c0_92 = arith.constant 0 : index
      %c0_93 = arith.constant 0 : index
      %78 = vector.load %arg8[%c0_92, %c0_93] : memref<128x128xf32, #tpu.memory_space<vmem>>, vector<128x128xf32>
      %c0_94 = arith.constant 0 : index
      %c0_95 = arith.constant 0 : index
      %79 = vector.load %arg5[%c0_94, %c0_95] : memref<1x128xf32, #tpu.memory_space<vmem>>, vector<1x128xf32>
      %80 = vector.broadcast %79 : vector<1x128xf32> to vector<128x128xf32>
      %81 = arith.addf %78, %80 : vector<128x128xf32>
      %c0_96 = arith.constant 0 : index
      %c0_97 = arith.constant 0 : index
      %82 = vector.load %arg6[%c0_96, %c0_97] : memref<128x128xbf16, #tpu.memory_space<vmem>>, vector<128x128xbf16>
      %83 = arith.extf %82 : vector<128x128xbf16> to vector<128x128xf32>
      %84 = arith.addf %81, %83 : vector<128x128xf32>
      %cst_98 = arith.constant 0.000000e+00 : f32
      %85 = vector.broadcast %cst_98 : f32 to vector<128x128xf32>
      %86 = arith.maximumf %84, %85 : vector<128x128xf32>
      %87 = arith.truncf %86 : vector<128x128xf32> to vector<128x128xbf16>
      %c0_99 = arith.constant 0 : index
      %c0_100 = arith.constant 0 : index
      %88 = vector.load %arg7[%c0_99, %c0_100] : memref<128x128xbf16, #tpu.memory_space<vmem>>, vector<128x128xbf16>
      tpu.vector_store %arg7[%c0_99, %c0_100], %87 {strides = array<i32>} : memref<128x128xbf16, #tpu.memory_space<vmem>>, vector<128x128xbf16>,
    } else {
    }
    return
  }
  func.func @transform_0(%arg0: i32, %arg1: i32, %arg2: i32) -> (i32, i32, i32) {
    %c0_i32 = arith.constant 0 : i32
    %c0_i32_0 = arith.constant 0 : i32
    return %arg2, %arg1, %c0_i32 : i32, i32, i32
  }
  func.func @transform_1(%arg0: i32, %arg1: i32, %arg2: i32) -> (i32, i32, i32) {
    %c0_i32 = arith.constant 0 : i32
    %c0_i32_0 = arith.constant 0 : i32
    return %arg2, %c0_i32, %arg0 : i32, i32, i32
  }
  func.func @transform_2(%arg0: i32, %arg1: i32, %arg2: i32) -> (i32, i32) {
    %c0_i32 = arith.constant 0 : i32
    %c0_i32_0 = arith.constant 0 : i32
    return %c0_i32, %arg0 : i32, i32
  }
  func.func @transform_3(%arg0: i32, %arg1: i32, %arg2: i32) -> (i32, i32) {
    %c0_i32 = arith.constant 0 : i32
    return %arg1, %arg0 : i32, i32
  }
  func.func @transform_4(%arg0: i32, %arg1: i32, %arg2: i32) -> (i32, i32) {
    %c0_i32 = arith.constant 0 : i32
    return %arg1, %arg0 : i32, i32
  }
}

</mosaic_0001>

<bundles_post_ra>
// kernel: _lambda_.1
= control target key start
LH: loop header
LB: loop body
LE: loop exit
PB: predicated region body
PF: predicated region fallthrough
CT: control target
= control target key end

     0   :  { %s3578_s0 = inlined_call_operand.vmem [shape: bf16[9,128,64], index: 0, kind: input, shape index: {}]   ;;  %s3579_s1 = inlined_call_operand.vmem [shape: bf16[9,64,128], index: 1, kind: input, shape index: {}]   ;;  %s3580_s2 = inlined_call_operand.vmem [shape: f32[1,128], index: 2, kind: input, shape index: {}]   ;;  %s3581_s3 = inlined_call_operand.vmem [shape: bf16[128,128], index: 3, kind: input, shape index: {}]   ;;  %s3582_s4 = inlined_call_operand.hbm [shape: bf16[128,128], index: 4, kind: output, shape index: {}]  }
   0x1   :  { %v2797_v0 = vld [vmem:[%s3579_s1 + $0x18] sm:$0xff]  ;;  %v2796_v1 = vld [vmem:[%s3579_s1 + $0x10] sm:$0xff]  ;;  %v2795_v2 = vld [vmem:[%s3579_s1 + $0x8] sm:$0xff] }
   0x2   :  { %2980 = vmatpush.bf16.msra.mxu1 %v2797_v0  ;;  %2981 = vmatpush.bf16.msra.mxu2 %v2797_v0  ;;  %v2794_v3 = vld [vmem:[%s3579_s1] sm:$0xff] }
   0x3   :  { %2982 = vmatpush.bf16.msra.mxu3 %v2797_v0  ;;  %172 = vmatpush.bf16.msra.mxu0 %v2797_v0 }
   0x6   :  { %2983 = vmatpush.bf16.msra.mxu1 %v2796_v1  ;;  %2984 = vmatpush.bf16.msra.mxu2 %v2796_v1 }
   0x7   :  { %2985 = vmatpush.bf16.msra.mxu3 %v2796_v1  ;;  %173 = vmatpush.bf16.msra.mxu0 %v2796_v1 }
   0xa   :  { %2986 = vmatpush.bf16.msra.mxu1 %v2795_v2  ;;  %2987 = vmatpush.bf16.msra.mxu2 %v2795_v2 }
   0xb   :  { %9 = vsyncpa [#allocation4], 0  ;;  %2988 = vmatpush.bf16.msra.mxu3 %v2795_v2  ;;  %174 = vmatpush.bf16.msra.mxu0 %v2795_v2  ;;  %v2821_v4 = vld [vmem:[%s3579_s1 + $0x58] sm:$0xff]  ;;  %v2788_v6 = vld [vmem:[%s3578_s0 + $0x10] sm:$0xff]  ;;  %vm143_vm0 = vcmask 523264   ;;  %s3022_s9 = smov [#allocation3]  }
   0xc   :  { %v2833_v5 = vld [vmem:[%s3579_s1 + $0x78] sm:$0xff]  ;;  %v2790_v7 = vld [vmem:[%s3578_s0 + $0x20] sm:$0xff]  ;;  %v2792_v8 = vld [vmem:[%s3578_s0 + $0x30] sm:$0xff]  ;;  %s2076_s10 = sshll.u32 %s3022_s9, 4  ;;  %s3023_s13 = smov 64   ;;  %s2077_s10 = int_to_ptr.vmem [resolvable:$true] %s2076_s10 }
   0xd   :  { %v2786_v9 = vld [vmem:[%s3578_s0] sm:$0xff]  ;;  %v2809_v10 = vld [vmem:[%s3579_s1 + $0x38] sm:$0xff]  ;;  %v2820_v12 = vld [vmem:[%s3579_s1 + $0x50] sm:$0xff]  ;;  %s3024_s14 = smov 4  }
   0xe   :  { %2989 = vmatpush.bf16.msra.mxu1 %v2794_v3  ;;  %2990 = vmatpush.bf16.msra.mxu2 %v2794_v3  ;;  %v2845_v11 = vld [vmem:[%s3579_s1 + $0x98] sm:$0xff]  ;;  %v2832_v13 = vld [vmem:[%s3579_s1 + $0x70] sm:$0xff]  ;;  %v2819_v16 = vld [vmem:[%s3579_s1 + $0x48] sm:$0xff] }
   0xf   :  { %2991 = vmatpush.bf16.msra.mxu3 %v2794_v3  ;;  %175 = vmatpush.bf16.msra.mxu0 %v2794_v3  ;;  %v2808_v14 = vld [vmem:[%s3579_s1 + $0x30] sm:$0xff]  ;;  %v2831_v17 = vld [vmem:[%s3579_s1 + $0x68] sm:$0xff]  ;;  %v2818_v20 = vld [vmem:[%s3579_s1 + $0x40] sm:$0xff] }
  0x10   :  { %v2844_v15 = vld [vmem:[%s3579_s1 + $0x90] sm:$0xff]  ;;  %v2807_v18 = vld [vmem:[%s3579_s1 + $0x28] sm:$0xff]  ;;  %v2830_v21 = vld [vmem:[%s3579_s1 + $0x60] sm:$0xff] }
  0x11   :  { %2140 = vmatmul.msk.bf16.vlgmr.msra.gmra.mxu1 %vm143_vm0, %v2788_v6  ;;  %2142 = vmatmul.msk.bf16.vlgmr.msra.gmra.mxu2 %vm143_vm0, %v2790_v7  ;;  %v2843_v19 = vld [vmem:[%s3579_s1 + $0x88] sm:$0xff]  ;;  %v2869_v22 = vld [vmem:[%s3579_s1 + $0xd8] sm:$0xff]  ;;  %v2806_v24 = vld [vmem:[%s3579_s1 + $0x20] sm:$0xff] }
  0x12   :  { %594 = vmatpush.bf16.msrb.mxu2 %v2821_v4  ;;  %2144 = vmatmul.msk.bf16.vlgmr.msra.gmra.mxu3 %vm143_vm0, %v2792_v8  ;;  %v2881_v23 = vld [vmem:[%s3579_s1 + $0xf8] sm:$0xff]  ;;  %v2842_v25 = vld [vmem:[%s3579_s1 + $0x80] sm:$0xff]  ;;  %v2791_v29 = vld [vmem:[%s3578_s0 + $0x28] sm:$0xff] }
  0x13   :  { %805 = vmatpush.bf16.msrb.mxu3 %v2833_v5  ;;  %2138 = vmatmul.msk.bf16.vlgmr.msra.gmra.mxu0 %vm143_vm0, %v2786_v9  ;;  %v2857_v26 = vld [vmem:[%s3579_s1 + $0xb8] sm:$0xff]  ;;  %v2787_v31 = vld [vmem:[%s3578_s0 + $0x8] sm:$0xff]  ;;  %v2798_v32 = vld [vmem:[%s3578_s0 + $0x40] sm:$0xff] }
  0x14   :  { %383 = vmatpush.bf16.msrb.mxu1 %v2809_v10  ;;  %1016 = vmatpush.bf16.msrb.mxu0 %v2845_v11  ;;  %v2893_v27 = vld [vmem:[%s3579_s1 + $0x118] sm:$0xff]  ;;  %v2810_v33 = vld [vmem:[%s3578_s0 + $0x80] sm:$0xff]  ;;  %v2868_v36 = vld [vmem:[%s3579_s1 + $0xd0] sm:$0xff] }
  0x15   :  { %v2789_v28 = vld [vmem:[%s3578_s0 + $0x18] sm:$0xff]  ;;  %v2822_v34 = vld [vmem:[%s3578_s0 + $0xc0] sm:$0xff]  ;;  %v2880_v37 = vld [vmem:[%s3579_s1 + $0xf0] sm:$0xff] }
  0x16   :  { %595 = vmatpush.bf16.msrb.mxu2 %v2820_v12  ;;  %v2793_v30 = vld [vmem:[%s3578_s0 + $0x38] sm:$0xff]  ;;  %v2834_v35 = vld [vmem:[%s3578_s0 + $0x100] sm:$0xff]  ;;  %v2856_v38 = vld [vmem:[%s3579_s1 + $0xb0] sm:$0xff] }
  0x17   :  { %806 = vmatpush.bf16.msrb.mxu3 %v2832_v13  ;;  %v2892_v39 = vld [vmem:[%s3579_s1 + $0x110] sm:$0xff]  ;;  %v2799_v40 = vld [vmem:[%s3578_s0 + $0x48] sm:$0xff]  ;;  %v2801_v52 = vld [vmem:[%s3578_s0 + $0x58] sm:$0xff] }
  0x18   :  { %384 = vmatpush.bf16.msrb.mxu1 %v2808_v14  ;;  %1017 = vmatpush.bf16.msrb.mxu0 %v2844_v15  ;;  %v2811_v41 = vld [vmem:[%s3578_s0 + $0x88] sm:$0xff]  ;;  %v2800_v44 = vld [vmem:[%s3578_s0 + $0x50] sm:$0xff]  ;;  %v2813_v53 = vld [vmem:[%s3578_s0 + $0x98] sm:$0xff] }
  0x19   :  { %v2823_v42 = vld [vmem:[%s3578_s0 + $0xc8] sm:$0xff]  ;;  %v2812_v45 = vld [vmem:[%s3578_s0 + $0x90] sm:$0xff]  ;;  %v2825_v54 = vld [vmem:[%s3578_s0 + $0xd8] sm:$0xff] }
  0x1a   :  { %596 = vmatpush.bf16.msrb.mxu2 %v2819_v16  ;;  %v2835_v43 = vld [vmem:[%s3578_s0 + $0x108] sm:$0xff]  ;;  %v2824_v46 = vld [vmem:[%s3578_s0 + $0xd0] sm:$0xff]  ;;  %v2837_v55 = vld [vmem:[%s3578_s0 + $0x118] sm:$0xff] }
  0x1b   :  { %807 = vmatpush.bf16.msrb.mxu3 %v2831_v17  ;;  %v2836_v47 = vld [vmem:[%s3578_s0 + $0x110] sm:$0xff]  ;;  %v2867_v48 = vld [vmem:[%s3579_s1 + $0xc8] sm:$0xff]  ;;  %v2802_v56 = vld [vmem:[%s3578_s0 + $0x60] sm:$0xff] }
  0x1c   :  { %385 = vmatpush.bf16.msrb.mxu1 %v2807_v18  ;;  %1018 = vmatpush.bf16.msrb.mxu0 %v2843_v19  ;;  %v2879_v49 = vld [vmem:[%s3579_s1 + $0xe8] sm:$0xff]  ;;  %v2814_v57 = vld [vmem:[%s3578_s0 + $0xa0] sm:$0xff]  ;;  %v2804_v4 = vld [vmem:[%s3578_s0 + $0x70] sm:$0xff] }
  0x1d   :  { %v2855_v50 = vld [vmem:[%s3579_s1 + $0xa8] sm:$0xff]  ;;  %v2826_v58 = vld [vmem:[%s3578_s0 + $0xe0] sm:$0xff]  ;;  %v2816_v5 = vld [vmem:[%s3578_s0 + $0xb0] sm:$0xff] }
  0x1e   :  { %597 = vmatpush.bf16.msrb.mxu2 %v2818_v20  ;;  %v2891_v51 = vld [vmem:[%s3579_s1 + $0x108] sm:$0xff]  ;;  %v2838_v59 = vld [vmem:[%s3578_s0 + $0x120] sm:$0xff]  ;;  %v2828_v7 = vld [vmem:[%s3578_s0 + $0xf0] sm:$0xff] }
  0x1f   :  { %808 = vmatpush.bf16.msrb.mxu3 %v2830_v21  ;;  %v2866_v60 = vld [vmem:[%s3579_s1 + $0xc0] sm:$0xff]  ;;  %v2803_v0 = vld [vmem:[%s3578_s0 + $0x68] sm:$0xff]  ;;  %v2840_v8 = vld [vmem:[%s3578_s0 + $0x130] sm:$0xff] }
  0x20   :  { %386 = vmatpush.bf16.msrb.mxu1 %v2806_v24  ;;  %1019 = vmatpush.bf16.msrb.mxu0 %v2842_v25  ;;  %v2878_v61 = vld [vmem:[%s3579_s1 + $0xe0] sm:$0xff]  ;;  %v2815_v1 = vld [vmem:[%s3578_s0 + $0xa8] sm:$0xff]  ;;  %v2805_v16 = vld [vmem:[%s3578_s0 + $0x78] sm:$0xff] }
  0x21   :  { %2141 = vmatmul.msk.bf16.gmra.mxu1 %vm143_vm0, %v2789_v28  ;;  %2143 = vmatmul.msk.bf16.gmra.mxu2 %vm143_vm0, %v2791_v29  ;;  %v2854_v62 = vld [vmem:[%s3579_s1 + $0xa0] sm:$0xff]  ;;  %v2827_v2 = vld [vmem:[%s3578_s0 + $0xe8] sm:$0xff]  ;;  %v2817_v17 = vld [vmem:[%s3578_s0 + $0xb8] sm:$0xff] }
  0x22   :  { %1438 = vmatpush.bf16.msra.mxu2 %v2869_v22  ;;  %2145 = vmatmul.msk.bf16.gmra.mxu3 %vm143_vm0, %v2793_v30  ;;  %v2890_v63 = vld [vmem:[%s3579_s1 + $0x100] sm:$0xff]  ;;  %v2839_v3 = vld [vmem:[%s3578_s0 + $0x128] sm:$0xff]  ;;  %v2829_v19 = vld [vmem:[%s3578_s0 + $0xf8] sm:$0xff] }
  0x23   :  { %1649 = vmatpush.bf16.msra.mxu3 %v2881_v23  ;;  %2139 = vmatmul.msk.bf16.gmra.mxu0 %vm143_vm0, %v2787_v31  ;;  %v2841_v20 = vld [vmem:[%s3578_s0 + $0x138] sm:$0xff]  ;;  %v2846_v28 = vld [vmem:[%s3578_s0 + $0x140] sm:$0xff] }
  0x24   :  { %1227 = vmatpush.bf16.msra.mxu1 %v2857_v26  ;;  %1860 = vmatpush.bf16.msra.mxu0 %v2893_v27  ;;  %v2858_v29 = vld [vmem:[%s3578_s0 + $0x180] sm:$0xff] }
  0x25   :  { %v2870_v31 = vld [vmem:[%s3578_s0 + $0x1c0] sm:$0xff] }
  0x26   :  { %1439 = vmatpush.bf16.msra.mxu2 %v2868_v36 }
  0x27   :  { %1650 = vmatpush.bf16.msra.mxu3 %v2880_v37 }
  0x28   :  { %1228 = vmatpush.bf16.msra.mxu1 %v2856_v38  ;;  %1861 = vmatpush.bf16.msra.mxu0 %v2892_v39 }
  0x2a   :  { %1440 = vmatpush.bf16.msra.mxu2 %v2867_v48 }
  0x2b   :  { %1651 = vmatpush.bf16.msra.mxu3 %v2879_v49  ;;  %v2871_v49 = vld [vmem:[%s3578_s0 + $0x1c8] sm:$0xff] }
  0x2c   :  { %1229 = vmatpush.bf16.msra.mxu1 %v2855_v50  ;;  %1862 = vmatpush.bf16.msra.mxu0 %v2891_v51  ;;  %v2883_v50 = vld [vmem:[%s3578_s0 + $0x208] sm:$0xff] }
  0x2e   :  { %1441 = vmatpush.bf16.msra.mxu2 %v2866_v60 }
  0x2f   :  { %1652 = vmatpush.bf16.msra.mxu3 %v2878_v61 }
  0x30   :  { %1230 = vmatpush.bf16.msra.mxu1 %v2854_v62  ;;  %1863 = vmatpush.bf16.msra.mxu0 %v2890_v63 }
  0x31   :  { %2218 = vmatmul.msk.bf16.vlgmr.msrb.gmra.mxu1 %vm143_vm0, %v2798_v32  ;;  %2298 = vmatmul.msk.bf16.vlgmr.msrb.gmra.mxu2 %vm143_vm0, %v2810_v33  ;;  %v2882_v32 = vld [vmem:[%s3578_s0 + $0x200] sm:$0xff] }
  0x32   :  { %2378 = vmatmul.msk.bf16.vlgmr.msrb.gmra.mxu3 %vm143_vm0, %v2822_v34 }
  0x33   :  { %2458 = vmatmul.msk.bf16.vlgmr.msrb.gmra.mxu0 %vm143_vm0, %v2834_v35 }
  0x41   :  { %2219 = vmatmul.msk.bf16.gmra.mxu1 %vm143_vm0, %v2799_v40  ;;  %2299 = vmatmul.msk.bf16.gmra.mxu2 %vm143_vm0, %v2811_v41 }
  0x42   :  { %2379 = vmatmul.msk.bf16.gmra.mxu3 %vm143_vm0, %v2823_v42 }
  0x43   :  { %2459 = vmatmul.msk.bf16.gmra.mxu0 %vm143_vm0, %v2835_v43 }
  0x51   :  { %2220 = vmatmul.msk.bf16.gmra.mxu1 %vm143_vm0, %v2800_v44  ;;  %2300 = vmatmul.msk.bf16.gmra.mxu2 %vm143_vm0, %v2812_v45 }
  0x52   :  { %2380 = vmatmul.msk.bf16.gmra.mxu3 %vm143_vm0, %v2824_v46  ;;  %v2847_v46 = vld [vmem:[%s3578_s0 + $0x148] sm:$0xff] }
  0x53   :  { %2460 = vmatmul.msk.bf16.gmra.mxu0 %vm143_vm0, %v2836_v47  ;;  %v2859_v47 = vld [vmem:[%s3578_s0 + $0x188] sm:$0xff] }
  0x61   :  { %2221 = vmatmul.msk.bf16.gmra.mxu1 %vm143_vm0, %v2801_v52  ;;  %2301 = vmatmul.msk.bf16.gmra.mxu2 %vm143_vm0, %v2813_v53 }
  0x62   :  { %2381 = vmatmul.msk.bf16.gmra.mxu3 %vm143_vm0, %v2825_v54 }
  0x63   :  { %2461 = vmatmul.msk.bf16.gmra.mxu0 %vm143_vm0, %v2837_v55 }
  0x71   :  { %2222 = vmatmul.msk.bf16.gmra.mxu1 %vm143_vm0, %v2802_v56  ;;  %2302 = vmatmul.msk.bf16.gmra.mxu2 %vm143_vm0, %v2814_v57 }
  0x72   :  { %2382 = vmatmul.msk.bf16.gmra.mxu3 %vm143_vm0, %v2826_v58 }
  0x73   :  { %2462 = vmatmul.msk.bf16.gmra.mxu0 %vm143_vm0, %v2838_v59 }
  0x81   :  { %2223 = vmatmul.msk.bf16.gmra.mxu1 %vm143_vm0, %v2803_v0  ;;  %2303 = vmatmul.msk.bf16.gmra.mxu2 %vm143_vm0, %v2815_v1 }
  0x82   :  { %2383 = vmatmul.msk.bf16.gmra.mxu3 %vm143_vm0, %v2827_v2  ;;  %v2848_v2 = vld [vmem:[%s3578_s0 + $0x150] sm:$0xff] }
  0x83   :  { %2463 = vmatmul.msk.bf16.gmra.mxu0 %vm143_vm0, %v2839_v3  ;;  %v2860_v3 = vld [vmem:[%s3578_s0 + $0x190] sm:$0xff] }
  0x8e   :  { %v3292_v6 = vpop.f32.mrf.mxu1 }
  0x90   :  { %v177_v9 = vpop.f32.mrf.mxu0 }
  0x91   :  { %2224 = vmatmul.msk.bf16.gmra.mxu1 %vm143_vm0, %v2804_v4  ;;  %2304 = vmatmul.msk.bf16.gmra.mxu2 %vm143_vm0, %v2816_v5  ;;  %v2872_v5 = vld [vmem:[%s3578_s0 + $0x1d0] sm:$0xff] }
  0x92   :  { %2384 = vmatmul.msk.bf16.gmra.mxu3 %vm143_vm0, %v2828_v7  ;;  %v2884_v7 = vld [vmem:[%s3578_s0 + $0x210] sm:$0xff] }
  0x93   :  { %2464 = vmatmul.msk.bf16.gmra.mxu0 %vm143_vm0, %v2840_v8 }
  0x94   :  { %v3304_v10 = vpop.f32.mrf.mxu2 }
  0x95   :  { %v3306_v11 = vpop.f32.mrf.mxu3 }
  0x96   :  { %v3308_v12 = vpop.f32.mrf.mxu1 }
  0x98   :  { %v179_v13 = vpop.f32.mrf.mxu0 }
  0x9c   :  { %v3310_v14 = vpop.f32.mrf.mxu2 }
  0x9d   :  { %v3312_v15 = vpop.f32.mrf.mxu3 }
  0x9e   :  { %v3320_v18 = vpop.f32.mrf.mxu1 }
  0xa0   :  { %v182_v21 = vpop.f32.mrf.mxu0 }
  0xa1   :  { %2225 = vmatmul.msk.bf16.gmra.mxu1 %vm143_vm0, %v2805_v16  ;;  %2305 = vmatmul.msk.bf16.gmra.mxu2 %vm143_vm0, %v2817_v17 }
  0xa2   :  { %2385 = vmatmul.msk.bf16.gmra.mxu3 %vm143_vm0, %v2829_v19 }
  0xa3   :  { %2465 = vmatmul.msk.bf16.gmra.mxu0 %vm143_vm0, %v2841_v20 }
  0xa4   :  { %v3332_v22 = vpop.f32.mrf.mxu2 }
  0xa5   :  { %v3334_v23 = vpop.f32.mrf.mxu3 }
  0xa6   :  { %v3336_v24 = vpop.f32.mrf.mxu1 }
  0xa8   :  { %v184_v25 = vpop.f32.mrf.mxu0 }
  0xac   :  { %v3338_v26 = vpop.f32.mrf.mxu2 }
  0xad   :  { %v3340_v27 = vpop.f32.mrf.mxu3 }
  0xae   :  { %v388_v30 = vpop.f32.mrf.mxu1 }
  0xaf   :  { %v428_v33 = vadd.f32 %v388_v30, %v177_v9 }
  0xb0   :  { %v1021_v34 = vpop.f32.mrf.mxu0 }
  0xb1   :  { %2538 = vmatmul.msk.bf16.vlgmr.msra.gmra.mxu1 %vm143_vm0, %v2846_v28  ;;  %2618 = vmatmul.msk.bf16.vlgmr.msra.gmra.mxu2 %vm143_vm0, %v2858_v29 }
  0xb2   :  { %2698 = vmatmul.msk.bf16.vlgmr.msra.gmra.mxu3 %vm143_vm0, %v2870_v31 }
  0xb3   :  { %2778 = vmatmul.msk.bf16.vlgmr.msra.gmra.mxu0 %vm143_vm0, %v2882_v32 }
  0xb4   :  { %v599_v35 = vpop.f32.mrf.mxu2 }
  0xb5   :  { %v639_v36 = vadd.f32 %v599_v35, %v428_v33  ;;  %v810_v37 = vpop.f32.mrf.mxu3  ;;  %v2849_v33 = vld [vmem:[%s3578_s0 + $0x158] sm:$0xff] }
  0xb6   :  { %v390_v38 = vpop.f32.mrf.mxu1 }
  0xb7   :  { %v850_v39 = vadd.f32 %v810_v37, %v639_v36  ;;  %v429_v40 = vadd.f32 %v390_v38, %v179_v13  ;;  %v2873_v36 = vld [vmem:[%s3578_s0 + $0x1d8] sm:$0xff] }
  0xb8   :  { %v1023_v41 = vpop.f32.mrf.mxu0 }
  0xb9   :  { %v3358_v42 = vadd.f32 %v1021_v34, %v850_v39  ;;  %v2861_v34 = vld [vmem:[%s3578_s0 + $0x198] sm:$0xff] }
  0xbc   :  { %v601_v43 = vpop.f32.mrf.mxu2 }
  0xbd   :  { %v640_v44 = vadd.f32 %v601_v43, %v429_v40  ;;  %v812_v45 = vpop.f32.mrf.mxu3 }
  0xbe   :  { %v393_v48 = vpop.f32.mrf.mxu1 }
  0xbf   :  { %v851_v51 = vadd.f32 %v812_v45, %v640_v44  ;;  %v430_v52 = vadd.f32 %v393_v48, %v182_v21 }
  0xc0   :  { %v1026_v53 = vpop.f32.mrf.mxu0 }
  0xc1   :  { %2539 = vmatmul.msk.bf16.gmra.mxu1 %vm143_vm0, %v2847_v46  ;;  %2619 = vmatmul.msk.bf16.gmra.mxu2 %vm143_vm0, %v2859_v47  ;;  %v3374_v54 = vadd.f32 %v1023_v41, %v851_v51 }
  0xc2   :  { %2699 = vmatmul.msk.bf16.gmra.mxu3 %vm143_vm0, %v2871_v49 }
  0xc3   :  { %2779 = vmatmul.msk.bf16.gmra.mxu0 %vm143_vm0, %v2883_v50 }
  0xc4   :  { %v604_v55 = vpop.f32.mrf.mxu2 }
  0xc5   :  { %v641_v56 = vadd.f32 %v604_v55, %v430_v52  ;;  %v815_v57 = vpop.f32.mrf.mxu3  ;;  %v2850_v52 = vld [vmem:[%s3578_s0 + $0x160] sm:$0xff] }
  0xc6   :  { %v395_v58 = vpop.f32.mrf.mxu1 }
  0xc7   :  { %v852_v59 = vadd.f32 %v815_v57, %v641_v56  ;;  %v431_v60 = vadd.f32 %v395_v58, %v184_v25  ;;  %v2874_v56 = vld [vmem:[%s3578_s0 + $0x1e0] sm:$0xff] }
  0xc8   :  { %v1028_v61 = vpop.f32.mrf.mxu0 }
  0xc9   :  { %v3378_v62 = vadd.f32 %v1026_v53, %v852_v59  ;;  %v2862_v53 = vld [vmem:[%s3578_s0 + $0x1a0] sm:$0xff] }
  0xcc   :  { %v606_v63 = vpop.f32.mrf.mxu2 }
  0xcd   :  { %v642_v0 = vadd.f32 %v606_v63, %v431_v60  ;;  %v817_v1 = vpop.f32.mrf.mxu3 }
  0xce   :  { %v398_v4 = vpop.f32.mrf.mxu1 }
  0xcf   :  { %v853_v8 = vadd.f32 %v817_v1, %v642_v0  ;;  %v432_v9 = vadd.f32 %v398_v4, %v3292_v6 }
  0xd0   :  { %v1031_v13 = vpop.f32.mrf.mxu0 }
  0xd1   :  { %2540 = vmatmul.msk.bf16.gmra.mxu1 %vm143_vm0, %v2848_v2  ;;  %2620 = vmatmul.msk.bf16.gmra.mxu2 %vm143_vm0, %v2860_v3  ;;  %v3395_v16 = vadd.f32 %v1028_v61, %v853_v8 }
  0xd2   :  { %2700 = vmatmul.msk.bf16.gmra.mxu3 %vm143_vm0, %v2872_v5 }
  0xd3   :  { %2780 = vmatmul.msk.bf16.gmra.mxu0 %vm143_vm0, %v2884_v7 }
  0xd4   :  { %v609_v17 = vpop.f32.mrf.mxu2 }
  0xd5   :  { %v643_v19 = vadd.f32 %v609_v17, %v432_v9  ;;  %v820_v20 = vpop.f32.mrf.mxu3 }
  0xd6   :  { %v400_v21 = vpop.f32.mrf.mxu1 }
  0xd7   :  { %v854_v25 = vadd.f32 %v820_v20, %v643_v19  ;;  %v433_v28 = vadd.f32 %v400_v21, %v3308_v12  ;;  %v2885_v12 = vld [vmem:[%s3578_s0 + $0x218] sm:$0xff]  ;;  %v2875_v19 = vld [vmem:[%s3578_s0 + $0x1e8] sm:$0xff] }
  0xd8   :  { %v1033_v29 = vpop.f32.mrf.mxu0 }
  0xd9   :  { %v3400_v6 = vadd.f32 %v1031_v13, %v854_v25  ;;  %v2851_v13 = vld [vmem:[%s3578_s0 + $0x168] sm:$0xff] }
  0xdc   :  { %v611_v30 = vpop.f32.mrf.mxu2 }
  0xdd   :  { %v644_v31 = vadd.f32 %v611_v30, %v433_v28  ;;  %v822_v32 = vpop.f32.mrf.mxu3 }
  0xde   :  { %v403_v35 = vpop.f32.mrf.mxu1 }
  0xdf   :  { %v855_v37 = vadd.f32 %v822_v32, %v644_v31  ;;  %v434_v38 = vadd.f32 %v403_v35, %v3320_v18 }
  0xe0   :  { %v1036_v39 = vpop.f32.mrf.mxu0 }
  0xe1   :  { %2541 = vmatmul.msk.bf16.gmra.mxu1 %vm143_vm0, %v2849_v33  ;;  %2621 = vmatmul.msk.bf16.gmra.mxu2 %vm143_vm0, %v2861_v34  ;;  %v3417_v40 = vadd.f32 %v1033_v29, %v855_v37 }
  0xe2   :  { %2701 = vmatmul.msk.bf16.gmra.mxu3 %vm143_vm0, %v2873_v36 }
  0xe3   :  { %2781 = vmatmul.msk.bf16.gmra.mxu0 %vm143_vm0, %v2885_v12 }
  0xe4   :  { %v614_v41 = vpop.f32.mrf.mxu2 }
  0xe5   :  { %v645_v43 = vadd.f32 %v614_v41, %v434_v38  ;;  %v825_v44 = vpop.f32.mrf.mxu3 }
  0xe6   :  { %v405_v45 = vpop.f32.mrf.mxu1 }
  0xe7   :  { %v856_v46 = vadd.f32 %v825_v44, %v645_v43  ;;  %v435_v47 = vadd.f32 %v405_v45, %v3336_v24  ;;  %v2886_v24 = vld [vmem:[%s3578_s0 + $0x220] sm:$0xff]  ;;  %v2876_v43 = vld [vmem:[%s3578_s0 + $0x1f0] sm:$0xff] }
  0xe8   :  { %v1038_v48 = vpop.f32.mrf.mxu0 }
  0xe9   :  { %v3422_v18 = vadd.f32 %v1036_v39, %v856_v46  ;;  %v2852_v39 = vld [vmem:[%s3578_s0 + $0x170] sm:$0xff] }
  0xec   :  { %v616_v49 = vpop.f32.mrf.mxu2 }
  0xed   :  { %v646_v50 = vadd.f32 %v616_v49, %v435_v47  ;;  %v827_v51 = vpop.f32.mrf.mxu3 }
  0xee   :  { %v408_v55 = vpop.f32.mrf.mxu1 }
  0xef   :  { %v857_v57 = vadd.f32 %v827_v51, %v646_v50  ;;  %v436_v60 = vadd.f32 %v408_v55, %v3304_v10  ;;  %v2863_v10 = vld [vmem:[%s3578_s0 + $0x1a8] sm:$0xff] }
  0xf0   :  { %v1041_v58 = vpop.f32.mrf.mxu0 }
  0xf1   :  { %2542 = vmatmul.msk.bf16.gmra.mxu1 %vm143_vm0, %v2850_v52  ;;  %2622 = vmatmul.msk.bf16.gmra.mxu2 %vm143_vm0, %v2862_v53  ;;  %v3438_v59 = vadd.f32 %v1038_v48, %v857_v57 }
  0xf2   :  { %2702 = vmatmul.msk.bf16.gmra.mxu3 %vm143_vm0, %v2874_v56 }
  0xf3   :  { %2782 = vmatmul.msk.bf16.gmra.mxu0 %vm143_vm0, %v2886_v24 }
  0xf4   :  { %v619_v61 = vpop.f32.mrf.mxu2 }
  0xf5   :  { %v647_v63 = vadd.f32 %v619_v61, %v436_v60  ;;  %v830_v0 = vpop.f32.mrf.mxu3  ;;  %v2853_v60 = vld [vmem:[%s3578_s0 + $0x178] sm:$0xff] }
  0xf6   :  { %v410_v1 = vpop.f32.mrf.mxu1 }
  0xf7   :  { %v858_v2 = vadd.f32 %v830_v0, %v647_v63  ;;  %v437_v5 = vadd.f32 %v410_v1, %v3310_v14  ;;  %v2887_v14 = vld [vmem:[%s3578_s0 + $0x228] sm:$0xff]  ;;  %v2877_v63 = vld [vmem:[%s3578_s0 + $0x1f8] sm:$0xff] }
  0xf8   :  { %v1043_v3 = vpop.f32.mrf.mxu0 }
  0xf9   :  { %v3443_v4 = vadd.f32 %v1041_v58, %v858_v2 }
  0xfc   :  { %v621_v7 = vpop.f32.mrf.mxu2 }
  0xfd   :  { %v648_v8 = vadd.f32 %v621_v7, %v437_v5  ;;  %v832_v9 = vpop.f32.mrf.mxu3 }
  0xfe   :  { %v413_v17 = vpop.f32.mrf.mxu1 }
  0xff   :  { %v859_v20 = vadd.f32 %v832_v9, %v648_v8  ;;  %v438_v28 = vadd.f32 %v413_v17, %v3332_v22  ;;  %v2864_v22 = vld [vmem:[%s3578_s0 + $0x1b0] sm:$0xff] }
 0x100   :  { %v1046_v21 = vpop.f32.mrf.mxu0 }
 0x101   :  { %2543 = vmatmul.msk.bf16.gmra.mxu1 %vm143_vm0, %v2851_v13  ;;  %2623 = vmatmul.msk.bf16.gmra.mxu2 %vm143_vm0, %v2863_v10  ;;  %v3460_v25 = vadd.f32 %v1043_v3, %v859_v20 }
 0x102   :  { %2703 = vmatmul.msk.bf16.gmra.mxu3 %vm143_vm0, %v2875_v19 }
 0x103   :  { %2783 = vmatmul.msk.bf16.gmra.mxu0 %vm143_vm0, %v2887_v14 }
 0x104   :  { %v624_v29 = vpop.f32.mrf.mxu2 }
 0x105   :  { %v649_v30 = vadd.f32 %v624_v29, %v438_v28  ;;  %v835_v31 = vpop.f32.mrf.mxu3 }
 0x106   :  { %v415_v32 = vpop.f32.mrf.mxu1 }
 0x107   :  { %v860_v33 = vadd.f32 %v835_v31, %v649_v30  ;;  %v439_v36 = vadd.f32 %v415_v32, %v3338_v26  ;;  %v2888_v26 = vld [vmem:[%s3578_s0 + $0x230] sm:$0xff] }
 0x108   :  { %v1048_v34 = vpop.f32.mrf.mxu0 }
 0x109   :  { %v3465_v35 = vadd.f32 %v1046_v21, %v860_v33 }
 0x10c   :  { %v626_v12 = vpop.f32.mrf.mxu2 }
 0x10d   :  { %v650_v37 = vadd.f32 %v626_v12, %v439_v36  ;;  %v837_v38 = vpop.f32.mrf.mxu3 }
 0x10e   :  { %v418_v41 = vpop.f32.mrf.mxu1 }
 0x10f   :  { %v861_v44 = vadd.f32 %v837_v38, %v650_v37  ;;  %v440_v47 = vadd.f32 %v418_v41, %v3306_v11  ;;  %v2865_v11 = vld [vmem:[%s3578_s0 + $0x1b8] sm:$0xff] }
 0x110   :  { %v1051_v45 = vpop.f32.mrf.mxu0 }
 0x111   :  { %2544 = vmatmul.msk.bf16.gmra.mxu1 %vm143_vm0, %v2852_v39  ;;  %2624 = vmatmul.msk.bf16.gmra.mxu2 %vm143_vm0, %v2864_v22  ;;  %v3482_v46 = vadd.f32 %v1048_v34, %v861_v44  ;;  %v2895_v22 = vld [vmem:[%s3581_s3] sm:$0xff]  }
 0x112   :  { %2704 = vmatmul.msk.bf16.gmra.mxu3 %vm143_vm0, %v2876_v43 }
 0x113   :  { %2784 = vmatmul.msk.bf16.gmra.mxu0 %vm143_vm0, %v2888_v26 }
 0x114   :  { %v629_v48 = vpop.f32.mrf.mxu2 }
 0x115   :  { %v651_v49 = vadd.f32 %v629_v48, %v440_v47  ;;  %v840_v50 = vpop.f32.mrf.mxu3 }
 0x116   :  { %v420_v51 = vpop.f32.mrf.mxu1 }
 0x117   :  { %v862_v52 = vadd.f32 %v840_v50, %v651_v49  ;;  %v441_v56 = vadd.f32 %v420_v51, %v3312_v15  ;;  %v2889_v15 = vld [vmem:[%s3578_s0 + $0x238] sm:$0xff]  ;;  %v2897_v50 = vunpack.c.h.bf16 %v2895_v22 }
 0x118   :  { %v1053_v53 = vpop.f32.mrf.mxu0 }
 0x119   :  { %v3487_v55 = vadd.f32 %v1051_v45, %v862_v52  ;;  %v2896_v45 = vunpack.c.l.bf16 %v2895_v22 }
 0x11c   :  { %v631_v24 = vpop.f32.mrf.mxu2 }
 0x11d   :  { %v652_v57 = vadd.f32 %v631_v24, %v441_v56  ;;  %v842_v58 = vpop.f32.mrf.mxu3 }
 0x11e   :  { %v423_v61 = vpop.f32.mrf.mxu1 }
 0x11f   :  { %v863_v0 = vadd.f32 %v842_v58, %v652_v57  ;;  %v442_v3 = vadd.f32 %v423_v61, %v3334_v23 }
 0x120   :  { %v1056_v1 = vpop.f32.mrf.mxu0 }
 0x121   :  { %2545 = vmatmul.msk.bf16.gmra.mxu1 %vm143_vm0, %v2853_v60  ;;  %2625 = vmatmul.msk.bf16.gmra.mxu2 %vm143_vm0, %v2865_v11  ;;  %v3504_v2 = vadd.f32 %v1053_v53, %v863_v0 }
 0x122   :  { %2705 = vmatmul.msk.bf16.gmra.mxu3 %vm143_vm0, %v2877_v63 }
 0x123   :  { %2785 = vmatmul.msk.bf16.gmra.mxu0 %vm143_vm0, %v2889_v15 }
 0x124   :  { %v634_v5 = vpop.f32.mrf.mxu2 }
 0x125   :  { %v653_v7 = vadd.f32 %v634_v5, %v442_v3  ;;  %v845_v8 = vpop.f32.mrf.mxu3  ;;  %v2966_v3 = vld [vmem:[%s3581_s3 + $0x8] sm:$0xff]  }
 0x126   :  { %v425_v9 = vpop.f32.mrf.mxu1 }
 0x127   :  { %v864_v13 = vadd.f32 %v845_v8, %v653_v7  ;;  %v443_v19 = vadd.f32 %v425_v9, %v3340_v27  ;;  %v3518_v27 = vld [vmem:[%s3580_s2] ss:$0 sm:$0xff] }
 0x128   :  { %v1058_v10 = vpop.f32.mrf.mxu0 }
 0x129   :  { %v3509_v17 = vadd.f32 %v1056_v1, %v864_v13  ;;  %v2900_v13 = vunpack.c.l.bf16 %v2966_v3 }
 0x12c   :  { %v636_v14 = vpop.f32.mrf.mxu2 }
 0x12d   :  { %v654_v20 = vadd.f32 %v636_v14, %v443_v19  ;;  %v847_v21 = vpop.f32.mrf.mxu3 }
 0x12e   :  { %v1232_v28 = vpop.f32.mrf.mxu1 }
 0x12f   :  { %v865_v29 = vadd.f32 %v847_v21, %v654_v20  ;;  %v1272_v23 = vadd.f32 %v1232_v28, %v3358_v42  ;;  %v2901_v20 = vunpack.c.h.bf16 %v2966_v3 }
 0x130   :  { %v1865_v30 = vpop.f32.mrf.mxu0 }
 0x131   :  { %v3512_v31 = vadd.f32 %v1058_v10, %v865_v29 }
 0x134   :  { %v1443_v32 = vpop.f32.mrf.mxu2 }
 0x135   :  { %v1483_v33 = vadd.f32 %v1443_v32, %v1272_v23  ;;  %v1654_v34 = vpop.f32.mrf.mxu3 }
 0x136   :  { %v1234_v36 = vpop.f32.mrf.mxu1 }
 0x137   :  { %v1694_v12 = vadd.f32 %v1654_v34, %v1483_v33  ;;  %v1273_v39 = vadd.f32 %v1234_v36, %v3374_v54 }
 0x138   :  { %v1867_v37 = vpop.f32.mrf.mxu0 }
 0x139   :  { %v1905_v38 = vadd.f32 %v1865_v30, %v1694_v12 }
 0x13b   :  { %v1960_v44 = vadd.f32 %v3518_v27, %v1905_v38 }
 0x13c   :  { %v1445_v41 = vpop.f32.mrf.mxu2 }
 0x13d   :  { %v1484_v42 = vadd.f32 %v1445_v41, %v1273_v39  ;;  %v1656_v43 = vpop.f32.mrf.mxu3  ;;  %v2008_v51 = vadd.f32 %v2896_v45, %v1960_v44  ;;  %v2967_v41 = vld [vmem:[%s3581_s3 + $0x10] sm:$0xff]  }
 0x13e   :  { %v1237_v26 = vpop.f32.mrf.mxu1  ;;  %v2904_v45 = vunpack.c.l.bf16 %v2967_v41 }
 0x13f   :  { %v1695_v47 = vadd.f32 %v1656_v43, %v1484_v42  ;;  %v1274_v54 = vadd.f32 %v1237_v26, %v3378_v62  ;;  %v2024_v60 = vmax.f32 %v2008_v51, 0.0 }
 0x140   :  { %v1870_v48 = vpop.f32.mrf.mxu0 }
 0x141   :  { %v1906_v49 = vadd.f32 %v1867_v37, %v1695_v47 }
 0x143   :  { %v1961_v52 = vadd.f32 %v3518_v27, %v1906_v49 }
 0x144   :  { %v1448_v53 = vpop.f32.mrf.mxu2 }
 0x145   :  { %v2009_v56 = vadd.f32 %v2897_v50, %v1961_v52  ;;  %v1485_v24 = vadd.f32 %v1448_v53, %v1274_v54  ;;  %v1659_v57 = vpop.f32.mrf.mxu3  ;;  %v2905_v50 = vunpack.c.h.bf16 %v2967_v41 }
 0x146   :  { %v1239_v58 = vpop.f32.mrf.mxu1 }
 0x147   :  { %v2025_v11 = vmax.f32 %v2009_v56, 0.0  ;;  %v1696_v61 = vadd.f32 %v1659_v57, %v1485_v24  ;;  %v1275_v1 = vadd.f32 %v1239_v58, %v3395_v16 }
 0x148   :  { %v1872_v63 = vpop.f32.mrf.mxu0 }
 0x149   :  { %v2929_v15 = vpack.c.bf16 %v2025_v11, %v2024_v60  ;;  %v1907_v0 = vadd.f32 %v1870_v48, %v1696_v61 }
 0x14b   :  { %2930 = vst [vmem:[#allocation3] sm:$0xff] %v2929_v15   ;;  %v1962_v9 = vadd.f32 %v3518_v27, %v1907_v0 }
 0x14c   :  { %v1450_v5 = vpop.f32.mrf.mxu2 }
 0x14d   :  { %v1486_v62 = vadd.f32 %v1450_v5, %v1275_v1  ;;  %v1661_v7 = vpop.f32.mrf.mxu3  ;;  %v2010_v21 = vadd.f32 %v2900_v13, %v1962_v9  ;;  %v2968_v1 = vld [vmem:[%s3581_s3 + $0x18] sm:$0xff]  }
 0x14e   :  { %v1242_v8 = vpop.f32.mrf.mxu1 }
 0x14f   :  { %v1697_v10 = vadd.f32 %v1661_v7, %v1486_v62  ;;  %v1276_v16 = vadd.f32 %v1242_v8, %v3400_v6  ;;  %v2026_v34 = vmax.f32 %v2010_v21, 0.0  ;;  %v2908_v8 = vunpack.c.l.bf16 %v2968_v1 }
 0x150   :  { %v1875_v19 = vpop.f32.mrf.mxu0 }
 0x151   :  { %v1908_v14 = vadd.f32 %v1872_v63, %v1697_v10 }
 0x153   :  { %v1963_v28 = vadd.f32 %v3518_v27, %v1908_v14 }
 0x154   :  { %v1453_v29 = vpop.f32.mrf.mxu2 }
 0x155   :  { %v2011_v30 = vadd.f32 %v2901_v20, %v1963_v28  ;;  %v1487_v23 = vadd.f32 %v1453_v29, %v1276_v16  ;;  %v1664_v32 = vpop.f32.mrf.mxu3 }
 0x156   :  { %v1244_v33 = vpop.f32.mrf.mxu1 }
 0x157   :  { %v2027_v36 = vmax.f32 %v2011_v30, 0.0  ;;  %v1698_v12 = vadd.f32 %v1664_v32, %v1487_v23  ;;  %v1277_v22 = vadd.f32 %v1244_v33, %v3417_v40 }
 0x158   :  { %v1877_v37 = vpop.f32.mrf.mxu0 }
 0x159   :  { %v2934_v38 = vpack.c.bf16 %v2027_v36, %v2026_v34  ;;  %v1909_v39 = vadd.f32 %v1875_v19, %v1698_v12  ;;  %v2909_v19 = vunpack.c.h.bf16 %v2968_v1 }
 0x15b   :  { %2973 = vst [vmem:[#allocation3 + $0x8] sm:$0xff] %v2934_v38   ;;  %v1964_v44 = vadd.f32 %v3518_v27, %v1909_v39  ;;  %v2969_v38 = vld [vmem:[%s3581_s3 + $0x20] sm:$0xff]  }
 0x15c   :  { %v1455_v42 = vpop.f32.mrf.mxu2 }
 0x15d   :  { %v1488_v6 = vadd.f32 %v1455_v42, %v1277_v22  ;;  %v1666_v43 = vpop.f32.mrf.mxu3  ;;  %v2012_v51 = vadd.f32 %v2904_v45, %v1964_v44  ;;  %v2913_v45 = vunpack.c.h.bf16 %v2969_v38 }
 0x15e   :  { %v1247_v26 = vpop.f32.mrf.mxu1 }
 0x15f   :  { %v1699_v47 = vadd.f32 %v1666_v43, %v1488_v6  ;;  %v1278_v40 = vadd.f32 %v1247_v26, %v3422_v18  ;;  %v2028_v58 = vmax.f32 %v2012_v51, 0.0  ;;  %v2912_v6 = vunpack.c.l.bf16 %v2969_v38 }
 0x160   :  { %v1880_v48 = vpop.f32.mrf.mxu0 }
 0x161   :  { %v1910_v49 = vadd.f32 %v1877_v37, %v1699_v47 }
 0x163   :  { %v1965_v52 = vadd.f32 %v3518_v27, %v1910_v49 }
 0x164   :  { %v1458_v54 = vpop.f32.mrf.mxu2 }
 0x165   :  { %v2013_v53 = vadd.f32 %v2905_v50, %v1965_v52  ;;  %v1489_v56 = vadd.f32 %v1458_v54, %v1278_v40  ;;  %v1669_v24 = vpop.f32.mrf.mxu3 }
 0x166   :  { %v1249_v57 = vpop.f32.mrf.mxu1 }
 0x167   :  { %v2029_v60 = vmax.f32 %v2013_v53, 0.0  ;;  %v1700_v11 = vadd.f32 %v1669_v24, %v1489_v56  ;;  %v1279_v0 = vadd.f32 %v1249_v57, %v3438_v59 }
 0x168   :  { %v1882_v61 = vpop.f32.mrf.mxu0 }
 0x169   :  { %v2939_v63 = vpack.c.bf16 %v2029_v60, %v2028_v58  ;;  %v1911_v15 = vadd.f32 %v1880_v48, %v1700_v11  ;;  %v2970_v11 = vld [vmem:[%s3581_s3 + $0x28] sm:$0xff]  }
 0x16a   :  { %v2916_v1 = vunpack.c.l.bf16 %v2970_v11 }
 0x16b   :  { %2974 = vst [vmem:[#allocation3 + $0x10] sm:$0xff] %v2939_v63   ;;  %v1966_v7 = vadd.f32 %v3518_v27, %v1911_v15 }
 0x16c   :  { %v1460_v3 = vpop.f32.mrf.mxu2 }
 0x16d   :  { %v1490_v18 = vadd.f32 %v1460_v3, %v1279_v0  ;;  %v1671_v5 = vpop.f32.mrf.mxu3  ;;  %v2014_v14 = vadd.f32 %v2908_v8, %v1966_v7 }
 0x16e   :  { %v1252_v62 = vpop.f32.mrf.mxu1 }
 0x16f   :  { %v1701_v9 = vadd.f32 %v1671_v5, %v1490_v18  ;;  %v1280_v59 = vadd.f32 %v1252_v62, %v3443_v4  ;;  %v2030_v23 = vmax.f32 %v2014_v14, 0.0  ;;  %v2917_v5 = vunpack.c.h.bf16 %v2970_v11 }
 0x170   :  { %v1885_v13 = vpop.f32.mrf.mxu0 }
 0x171   :  { %v1912_v10 = vadd.f32 %v1882_v61, %v1701_v9 }
 0x173   :  { %v1967_v20 = vadd.f32 %v3518_v27, %v1912_v10 }
 0x174   :  { %v1463_v21 = vpop.f32.mrf.mxu2 }
 0x175   :  { %v2015_v28 = vadd.f32 %v2909_v19, %v1967_v20  ;;  %v1491_v16 = vadd.f32 %v1463_v21, %v1280_v59  ;;  %v1674_v29 = vpop.f32.mrf.mxu3 }
 0x176   :  { %v1254_v30 = vpop.f32.mrf.mxu1 }
 0x177   :  { %v2031_v32 = vmax.f32 %v2015_v28, 0.0  ;;  %v1702_v33 = vadd.f32 %v1674_v29, %v1491_v16  ;;  %v1281_v37 = vadd.f32 %v1254_v30, %v3460_v25  ;;  %v2971_v30 = vld [vmem:[%s3581_s3 + $0x30] sm:$0xff]  }
 0x178   :  { %v1887_v34 = vpop.f32.mrf.mxu0 }
 0x179   :  { %v2944_v36 = vpack.c.bf16 %v2031_v32, %v2030_v23  ;;  %v1913_v12 = vadd.f32 %v1885_v13, %v1702_v33 }
 0x17b   :  { %2975 = vst [vmem:[#allocation3 + $0x18] sm:$0xff] %v2944_v36   ;;  %v1968_v42 = vadd.f32 %v3518_v27, %v1913_v12  ;;  %v2920_v12 = vunpack.c.l.bf16 %v2971_v30 }
 0x17c   :  { %v1465_v39 = vpop.f32.mrf.mxu2 }
 0x17d   :  { %v1492_v4 = vadd.f32 %v1465_v39, %v1281_v37  ;;  %v1676_v22 = vpop.f32.mrf.mxu3  ;;  %v2016_v47 = vadd.f32 %v2912_v6, %v1968_v42  ;;  %v2921_v39 = vunpack.c.h.bf16 %v2971_v30 }
 0x17e   :  { %v1257_v41 = vpop.f32.mrf.mxu1 }
 0x17f   :  { %v1703_v43 = vadd.f32 %v1676_v22, %v1492_v4  ;;  %v1282_v25 = vadd.f32 %v1257_v41, %v3465_v35  ;;  %v2032_v54 = vmax.f32 %v2016_v47, 0.0 }
 0x180   :  { %v1890_v26 = vpop.f32.mrf.mxu0 }
 0x181   :  { %v1914_v44 = vadd.f32 %v1887_v34, %v1703_v43 }
 0x183   :  { %v1969_v48 = vadd.f32 %v3518_v27, %v1914_v44 }
 0x184   :  { %v1468_v49 = vpop.f32.mrf.mxu2 }
 0x185   :  { %v2017_v50 = vadd.f32 %v2913_v45, %v1969_v48  ;;  %v1493_v51 = vadd.f32 %v1468_v49, %v1282_v25  ;;  %v1679_v52 = vpop.f32.mrf.mxu3 }
 0x186   :  { %v1259_v40 = vpop.f32.mrf.mxu1 }
 0x187   :  { %v2033_v53 = vmax.f32 %v2017_v50, 0.0  ;;  %v1704_v56 = vadd.f32 %v1679_v52, %v1493_v51  ;;  %v1283_v60 = vadd.f32 %v1259_v40, %v3482_v46  ;;  %v2972_v51 = vld [vmem:[%s3581_s3 + $0x38] sm:$0xff]   ;;  %s2078_s3 = sshll.u32 %s3582_s4, 4  ;;  %s2079_s3 = int_to_ptr.hbm [resolvable:$true] %s2078_s3 }
 0x188   :  { %v1892_v24 = vpop.f32.mrf.mxu0 }
 0x189   :  { %v2949_v57 = vpack.c.bf16 %v2033_v53, %v2032_v54  ;;  %v1915_v58 = vadd.f32 %v1890_v26, %v1704_v56  ;;  %v2924_v53 = vunpack.c.l.bf16 %v2972_v51 }
 0x18b   :  { %2976 = vst [vmem:[#allocation3 + $0x20] sm:$0xff] %v2949_v57   ;;  %v1970_v0 = vadd.f32 %v3518_v27, %v1915_v58  ;;  %v2925_v58 = vunpack.c.h.bf16 %v2972_v51 }
 0x18c   :  { %v1470_v61 = vpop.f32.mrf.mxu2 }
 0x18d   :  { %v1494_v35 = vadd.f32 %v1470_v61, %v1283_v60  ;;  %v1681_v63 = vpop.f32.mrf.mxu3  ;;  %v2018_v7 = vadd.f32 %v2916_v1, %v1970_v0 }
 0x18e   :  { %v1262_v15 = vpop.f32.mrf.mxu1 }
 0x18f   :  { %v1705_v3 = vadd.f32 %v1681_v63, %v1494_v35  ;;  %v1284_v46 = vadd.f32 %v1262_v15, %v3487_v55  ;;  %v2034_v20 = vmax.f32 %v2018_v7, 0.0 }
 0x190   :  { %v1895_v62 = vpop.f32.mrf.mxu0 }
 0x191   :  { %v1916_v18 = vadd.f32 %v1892_v24, %v1705_v3 }
 0x193   :  { %v1971_v8 = vadd.f32 %v3518_v27, %v1916_v18 }
 0x194   :  { %v1473_v9 = vpop.f32.mrf.mxu2 }
 0x195   :  { %v2019_v13 = vadd.f32 %v2917_v5, %v1971_v8  ;;  %v1495_v10 = vadd.f32 %v1473_v9, %v1284_v46  ;;  %v1684_v19 = vpop.f32.mrf.mxu3 }
 0x196   :  { %v1264_v14 = vpop.f32.mrf.mxu1 }
 0x197   :  { %v2035_v59 = vmax.f32 %v2019_v13, 0.0  ;;  %v1706_v21 = vadd.f32 %v1684_v19, %v1495_v10  ;;  %v1285_v29 = vadd.f32 %v1264_v14, %v3504_v2 }
 0x198   :  { %v1897_v23 = vpop.f32.mrf.mxu0 }
 0x199   :  { %v2954_v28 = vpack.c.bf16 %v2035_v59, %v2034_v20  ;;  %v1917_v16 = vadd.f32 %v1895_v62, %v1706_v21 }
 0x19b   :  { %2977 = vst [vmem:[#allocation3 + $0x28] sm:$0xff] %v2954_v28   ;;  %v1972_v36 = vadd.f32 %v3518_v27, %v1917_v16 }
 0x19c   :  { %v1475_v32 = vpop.f32.mrf.mxu2 }
 0x19d   :  { %v1496_v55 = vadd.f32 %v1475_v32, %v1285_v29  ;;  %v1686_v33 = vpop.f32.mrf.mxu3  ;;  %v2020_v4 = vadd.f32 %v2920_v12, %v1972_v36 }
 0x19e   :  { %v1267_v34 = vpop.f32.mrf.mxu1 }
 0x19f   :  { %v1707_v37 = vadd.f32 %v1686_v33, %v1496_v55  ;;  %v1286_v2 = vadd.f32 %v1267_v34, %v3509_v17  ;;  %v2036_v44 = vmax.f32 %v2020_v4, 0.0 }
 0x1a0   :  { %v1900_v26 = vpop.f32.mrf.mxu0 }
 0x1a1   :  { %v1918_v38 = vadd.f32 %v1897_v23, %v1707_v37 }
 0x1a3   :  { %v1973_v22 = vadd.f32 %v3518_v27, %v1918_v38 }
 0x1a4   :  { %v1478_v41 = vpop.f32.mrf.mxu2 }
 0x1a5   :  { %v2021_v42 = vadd.f32 %v2921_v39, %v1973_v22  ;;  %v1497_v6 = vadd.f32 %v1478_v41, %v1286_v2  ;;  %v1689_v43 = vpop.f32.mrf.mxu3 }
 0x1a6   :  { %v1269_v48 = vpop.f32.mrf.mxu1 }
 0x1a7   :  { %v2037_v45 = vmax.f32 %v2021_v42, 0.0  ;;  %v1708_v47 = vadd.f32 %v1689_v43, %v1497_v6  ;;  %v1287_v50 = vadd.f32 %v1269_v48, %v3512_v31 }
 0x1a8   :  { %v1902_v24 = vpop.f32.mrf.mxu0 }
 0x1a9   :  { %v2959_v25 = vpack.c.bf16 %v2037_v45, %v2036_v44  ;;  %v1919_v49 = vadd.f32 %v1900_v26, %v1708_v47 }
 0x1ab   :  { %2978 = vst [vmem:[#allocation3 + $0x30] sm:$0xff] %v2959_v25   ;;  %v1974_v54 = vadd.f32 %v3518_v27, %v1919_v49 }
 0x1ac   :  { %v1480_v52 = vpop.f32.mrf.mxu2 }
 0x1ad   :  { %v1498_v17 = vadd.f32 %v1480_v52, %v1287_v50  ;;  %v1691_v40 = vpop.f32.mrf.mxu3  ;;  %v2022_v60 = vadd.f32 %v2924_v53, %v1974_v54 }
 0x1af   :  { %v1709_v56 = vadd.f32 %v1691_v40, %v1498_v17  ;;  %v2038_v31 = vmax.f32 %v2022_v60, 0.0 }
 0x1b1   :  { %v1920_v57 = vadd.f32 %v1902_v24, %v1709_v56 }
 0x1b3   :  { %v1975_v11 = vadd.f32 %v3518_v27, %v1920_v57 }
 0x1b5   :  { %v2023_v61 = vadd.f32 %v2925_v58, %v1975_v11 }
 0x1b7   :  { %v2039_v35 = vmax.f32 %v2023_v61, 0.0 }
 0x1b9   :  { %v2964_v63 = vpack.c.bf16 %v2039_v35, %v2038_v31 }
 0x1bb   :  { %2979 = vst [vmem:[#allocation3 + $0x38] sm:$0xff] %v2964_v63  }
 0x1bc   :  { %2084 = dma.vmem_to_hbm [thread:$0]  %s2077_s10, 1024, %s2079_s3, [#allocation4], %s3023_s13, %s3023_s13, %s3024_s14  }
 0x1bd   :  { %3020 = dma.done.wait [#allocation4], 1024  }
 0x1be   :  { %3021 = vsyncadd [#allocation4], 4294966272 }
 0x1bf   :  { %2089 = vsyncpa [#allocation4], 1 }

</bundles_post_ra>
